<compile_context>
chip_gen: v7x
topology: tpu7x:2x2x1
jax: 0.10.0
libtpu: 0.0.40
codegen_flags: <defaults>
</compile_context>

<pallas_src>
import functools
import math

import jax
import jax.numpy as jnp
from jax.experimental import pallas as pl
from jax.experimental.pallas import tpu as pltpu

BN_EPS = 1e-5


# ----------------------------------------------------------------------------
# Fused kernel: conv3x3+BN+ReLU -> conv3x3+BN -> +residual -> ReLU
# ----------------------------------------------------------------------------
def _resnet_block_kernel(x_ref, w1_ref, b1_ref, w2_ref, b2_ref, o_ref, xpad,
                         *, H, W):
    # x_ref  : (NB, H, W, C)       NHWC input block (also the residual)
    # w*_ref : (9*C, C)            conv taps (tap-major rows), BN scale folded
    # b*_ref : (1, C)              folded BN shift (f32)
    # o_ref  : (NB, H, W, C)
    # xpad   : (NB, H+2, W+2, C)   VMEM scratch, reused for both convs
    NB = x_ref.shape[0]
    C = x_ref.shape[3]
    M = NB * H * W

    # Zero the padded scratch once; the 1-pixel halo stays zero for both convs.
    xpad[...] = jnp.zeros_like(xpad)
    xpad[:, pl.ds(1, H), pl.ds(1, W), :] = x_ref[...]

    def conv3x3(w_ref, b_ref):
        # im2col: gather the 9 shifted windows and issue ONE (M, 9C) x (9C, C)
        # matmul on the MXU.  BN scale is folded into w, so only +bias remains.
        taps = [xpad[:, pl.ds(ky, H), pl.ds(kx, W), :]
                for ky in range(3) for kx in range(3)]
        col = jnp.concatenate(taps, axis=-1).reshape(M, 9 * C)
        return jnp.dot(col, w_ref[...],
                       preferred_element_type=jnp.float32) + b_ref[...]

    # conv1 + BN1 + ReLU
    y = jnp.maximum(conv3x3(w1_ref, b1_ref), 0.0)
    # Feed conv2 straight from VMEM: overwrite the interior of the scratch.
    xpad[:, pl.ds(1, H), pl.ds(1, W), :] = y.reshape(NB, H, W, C).astype(xpad.dtype)
    # conv2 + BN2, then residual add + ReLU (all in f32)
    y = conv3x3(w2_ref, b2_ref)
    y = jnp.maximum(y + x_ref[...].reshape(M, C).astype(jnp.float32), 0.0)
    o_ref[...] = y.reshape(NB, H, W, C).astype(o_ref.dtype)


# ----------------------------------------------------------------------------
# Wrapper
# ----------------------------------------------------------------------------
def _fold_bn_into_conv(w, bn):
    """Fold eval-mode BatchNorm into the conv weight.

    w : (9, C_in, C_out)   tap index = ky*3 + kx
    bn: (gamma, beta, running_mean, running_var)
    returns (w_folded (9*C_in, C_out), shift (1, C_out))
    """
    gamma, beta, mean, var = bn
    scale = gamma * jax.lax.rsqrt(var + BN_EPS)
    shift = beta - mean * scale
    w_folded = (w * scale[None, None, :]).reshape(-1, w.shape[-1])
    return w_folded, shift.reshape(1, -1)


def resnet_block_forward(x_nchw, params, *, batch_block=None,
                         compute_dtype=jnp.float32):
    """ResNetBlock.forward: (N, C, H, W) -> (N, C, H, W)."""
    N, C, H, W = x_nchw.shape
    x = jnp.transpose(x_nchw, (0, 2, 3, 1)).astype(compute_dtype)   # NHWC

    w1, b1 = _fold_bn_into_conv(params["w1"], params["bn1"])
    w2, b2 = _fold_bn_into_conv(params["w2"], params["bn2"])
    w1 = w1.astype(compute_dtype)
    w2 = w2.astype(compute_dtype)
    b1 = b1.astype(jnp.float32)
    b2 = b2.astype(jnp.float32)

    NB = N if batch_block is None else batch_block
    assert N % NB == 0, "batch_block must divide the batch size"

    kernel = functools.partial(_resnet_block_kernel, H=H, W=W)
    out = pl.pallas_call(
        kernel,
        out_shape=jax.ShapeDtypeStruct((N, H, W, C), jnp.float32),
        grid=(N // NB,),
        in_specs=[
            pl.BlockSpec((NB, H, W, C), lambda n: (n, 0, 0, 0)),
            pl.BlockSpec((9 * C, C), lambda n: (0, 0)),
            pl.BlockSpec((1, C), lambda n: (0, 0)),
            pl.BlockSpec((9 * C, C), lambda n: (0, 0)),
            pl.BlockSpec((1, C), lambda n: (0, 0)),
        ],
        out_specs=pl.BlockSpec((NB, H, W, C), lambda n: (n, 0, 0, 0)),
        scratch_shapes=[pltpu.VMEM((NB, H + 2, W + 2, C), compute_dtype)],
        compiler_params=pltpu.CompilerParams(
            dimension_semantics=("parallel",)),
    )(x, w1, b1, w2, b2)
    return jnp.transpose(out, (0, 3, 1, 2))


# ----------------------------------------------------------------------------
# Deterministic parameter construction (Conv2d: kaiming-style, no bias;
# BatchNorm2d at PyTorch defaults: gamma=1, beta=0, mean=0, var=1)
# ----------------------------------------------------------------------------
def init_resnet_block_params(key, num_filters):
    k1, k2 = jax.random.split(key)

    def kaiming(k):
        fan_in = num_filters * 9
        bound = math.sqrt(2.0) * math.sqrt(3.0 / fan_in)
        return jax.random.uniform(k, (9, num_filters, num_filters),
                                  jnp.float32, -bound, bound)

    def bn():
        return (jnp.ones((num_filters,), jnp.float32),    # gamma
                jnp.zeros((num_filters,), jnp.float32),   # beta
                jnp.zeros((num_filters,), jnp.float32),   # running_mean
                jnp.ones((num_filters,), jnp.float32))    # running_var

    return {"w1": kaiming(k1), "bn1": bn(), "w2": kaiming(k2), "bn2": bn()}


# ----------------------------------------------------------------------------
# Pure-JAX reference (lax conv) for correctness checking
# ----------------------------------------------------------------------------
def reference_forward(x_nchw, params):
    x = jnp.transpose(x_nchw, (0, 2, 3, 1)).astype(jnp.float32)
    C = x.shape[-1]

    def conv_bn(h, w9, bn):
        gamma, beta, mean, var = bn
        w = w9.reshape(3, 3, C, C)   # (ky, kx, Cin, Cout) == HWIO
        y = jax.lax.conv_general_dilated(
            h, w, window_strides=(1, 1), padding="SAME",
            dimension_numbers=("NHWC", "HWIO", "NHWC"))
        scale = gamma * jax.lax.rsqrt(var + BN_EPS)
        return y * scale + (beta - mean * scale)

    y = jnp.maximum(conv_bn(x, params["w1"], params["bn1"]), 0.0)
    y = conv_bn(y, params["w2"], params["bn2"])
    y = jnp.maximum(y + x, 0.0)
    return jnp.transpose(y, (0, 3, 1, 2))


if __name__ == "__main__":
    key = jax.random.PRNGKey(0)
    N, num_filters, H, W = 2, 32, 8, 8

    params = init_resnet_block_params(key, num_filters)
    x = jax.random.normal(jax.random.fold_in(key, 1),
                          (N, num_filters, H, W), jnp.float32)

    ref = reference_forward(x, params)

    # Fused kernel, whole batch per grid step (M = N*H*W rows per matmul).
    out = jax.block_until_ready(resnet_block_forward(x, params))
    assert out.shape == (N, num_filters, H, W)
    assert bool(jnp.all(jnp.isfinite(out)))
    assert bool(jnp.allclose(out, ref, atol=1e-4, rtol=1e-4)), \
        float(jnp.max(jnp.abs(out - ref)))

    # Per-sample grid: 'parallel' batch axis -> both TensorCores on v7x.
    out2 = jax.block_until_ready(
        resnet_block_forward(x, params, batch_block=1))
    assert bool(jnp.allclose(out2, ref, atol=1e-4, rtol=1e-4))

    # bf16 compute path (f32 accumulation) for v6e/v7x.
    out_bf16 = jax.block_until_ready(
        resnet_block_forward(x, params, compute_dtype=jnp.bfloat16))
    assert bool(jnp.all(jnp.isfinite(out_bf16)))
    assert bool(jnp.allclose(out_bf16, ref, atol=0.2, rtol=0.1))

    print("KERNEL_OK")
</pallas_src>

<mosaic_0001>
module attributes {stable_mosaic.version = 11 : i64} {
  func.func @_resnet_block_kernel(%arg0: i32, %arg1: memref<2x8x8x32xf32, #tpu.memory_space<vmem>>, %arg2: memref<288x32xf32, #tpu.memory_space<vmem>>, %arg3: memref<1x32xf32, #tpu.memory_space<vmem>>, %arg4: memref<288x32xf32, #tpu.memory_space<vmem>>, %arg5: memref<1x32xf32, #tpu.memory_space<vmem>>, %arg6: memref<2x8x8x32xf32, #tpu.memory_space<vmem>>, %arg7: memref<2x10x10x32xf32, #tpu.memory_space<vmem>>) attributes {dimension_semantics = [#tpu.dimension_semantics<parallel>], iteration_bounds = array<i64: 1>, scalar_prefetch = 0 : i64, scratch_operands = 1 : i64, tpu.core_type = #tpu.core_type<tc>, window_params = [{transform_indices = @transform_0, window_bounds = array<i64: 2, 8, 8, 32>}, {pipeline_mode = #tpu.pipeline_mode<synchronous>, transform_indices = @transform_1, window_bounds = array<i64: 288, 32>}, {pipeline_mode = #tpu.pipeline_mode<synchronous>, transform_indices = @transform_2, window_bounds = array<i64: 1, 32>}, {pipeline_mode = #tpu.pipeline_mode<synchronous>, transform_indices = @transform_3, window_bounds = array<i64: 288, 32>}, {pipeline_mode = #tpu.pipeline_mode<synchronous>, transform_indices = @transform_4, window_bounds = array<i64: 1, 32>}, {transform_indices = @transform_5, window_bounds = array<i64: 2, 8, 8, 32>}]} {
    %cst = arith.constant 0.000000e+00 : f32
    %0 = vector.broadcast %cst : f32 to vector<2x10x10x32xf32>
    %c0 = arith.constant 0 : index
    %c0_0 = arith.constant 0 : index
    %c0_1 = arith.constant 0 : index
    %c0_2 = arith.constant 0 : index
    %1 = vector.load %arg7[%c0, %c0_0, %c0_1, %c0_2] : memref<2x10x10x32xf32, #tpu.memory_space<vmem>>, vector<2x10x10x32xf32>
    tpu.vector_store %arg7[%c0, %c0_0, %c0_1, %c0_2], %0 {strides = array<i32>} : memref<2x10x10x32xf32, #tpu.memory_space<vmem>>, vector<2x10x10x32xf32>,
    %c0_3 = arith.constant 0 : index
    %c0_4 = arith.constant 0 : index
    %c0_5 = arith.constant 0 : index
    %c0_6 = arith.constant 0 : index
    %2 = vector.load %arg1[%c0_3, %c0_4, %c0_5, %c0_6] : memref<2x8x8x32xf32, #tpu.memory_space<vmem>>, vector<2x8x8x32xf32>
    %c0_7 = arith.constant 0 : index
    %c1 = arith.constant 1 : index
    %c1_8 = arith.constant 1 : index
    %c0_9 = arith.constant 0 : index
    %3 = vector.load %arg7[%c0_7, %c1, %c1_8, %c0_9] : memref<2x10x10x32xf32, #tpu.memory_space<vmem>>, vector<2x8x8x32xf32>
    tpu.vector_store %arg7[%c0_7, %c1, %c1_8, %c0_9], %2 {strides = array<i32>} : memref<2x10x10x32xf32, #tpu.memory_space<vmem>>, vector<2x8x8x32xf32>,
    %c0_10 = arith.constant 0 : index
    %c0_11 = arith.constant 0 : index
    %c0_12 = arith.constant 0 : index
    %c0_13 = arith.constant 0 : index
    %4 = vector.load %arg7[%c0_10, %c0_11, %c0_12, %c0_13] : memref<2x10x10x32xf32, #tpu.memory_space<vmem>>, vector<2x8x8x32xf32>
    %c0_14 = arith.constant 0 : index
    %c0_15 = arith.constant 0 : index
    %c1_16 = arith.constant 1 : index
    %c0_17 = arith.constant 0 : index
    %5 = vector.load %arg7[%c0_14, %c0_15, %c1_16, %c0_17] : memref<2x10x10x32xf32, #tpu.memory_space<vmem>>, vector<2x8x8x32xf32>
    %c0_18 = arith.constant 0 : index
    %c0_19 = arith.constant 0 : index
    %c2 = arith.constant 2 : index
    %c0_20 = arith.constant 0 : index
    %6 = vector.load %arg7[%c0_18, %c0_19, %c2, %c0_20] : memref<2x10x10x32xf32, #tpu.memory_space<vmem>>, vector<2x8x8x32xf32>
    %c0_21 = arith.constant 0 : index
    %c1_22 = arith.constant 1 : index
    %c0_23 = arith.constant 0 : index
    %c0_24 = arith.constant 0 : index
    %7 = vector.load %arg7[%c0_21, %c1_22, %c0_23, %c0_24] : memref<2x10x10x32xf32, #tpu.memory_space<vmem>>, vector<2x8x8x32xf32>
    %c0_25 = arith.constant 0 : index
    %c1_26 = arith.constant 1 : index
    %c1_27 = arith.constant 1 : index
    %c0_28 = arith.constant 0 : index
    %8 = vector.load %arg7[%c0_25, %c1_26, %c1_27, %c0_28] : memref<2x10x10x32xf32, #tpu.memory_space<vmem>>, vector<2x8x8x32xf32>
    %c0_29 = arith.constant 0 : index
    %c1_30 = arith.constant 1 : index
    %c2_31 = arith.constant 2 : index
    %c0_32 = arith.constant 0 : index
    %9 = vector.load %arg7[%c0_29, %c1_30, %c2_31, %c0_32] : memref<2x10x10x32xf32, #tpu.memory_space<vmem>>, vector<2x8x8x32xf32>
    %c0_33 = arith.constant 0 : index
    %c2_34 = arith.constant 2 : index
    %c0_35 = arith.constant 0 : index
    %c0_36 = arith.constant 0 : index
    %10 = vector.load %arg7[%c0_33, %c2_34, %c0_35, %c0_36] : memref<2x10x10x32xf32, #tpu.memory_space<vmem>>, vector<2x8x8x32xf32>
    %c0_37 = arith.constant 0 : index
    %c2_38 = arith.constant 2 : index
    %c1_39 = arith.constant 1 : index
    %c0_40 = arith.constant 0 : index
    %11 = vector.load %arg7[%c0_37, %c2_38, %c1_39, %c0_40] : memref<2x10x10x32xf32, #tpu.memory_space<vmem>>, vector<2x8x8x32xf32>
    %c0_41 = arith.constant 0 : index
    %c2_42 = arith.constant 2 : index
    %c2_43 = arith.constant 2 : index
    %c0_44 = arith.constant 0 : index
    %12 = vector.load %arg7[%c0_41, %c2_42, %c2_43, %c0_44] : memref<2x10x10x32xf32, #tpu.memory_space<vmem>>, vector<2x8x8x32xf32>
    %13 = tpu.concatenate %4, %5, %6, %7, %8, %9, %10, %11, %12 in 3 : vector<2x8x8x32xf32>, vector<2x8x8x32xf32>, vector<2x8x8x32xf32>, vector<2x8x8x32xf32>, vector<2x8x8x32xf32>, vector<2x8x8x32xf32>, vector<2x8x8x32xf32>, vector<2x8x8x32xf32>, vector<2x8x8x32xf32> -> vector<2x8x8x288xf32>
    %14 = vector.shape_cast %13 : vector<2x8x8x288xf32> to vector<128x288xf32>
    %c0_45 = arith.constant 0 : index
    %c0_46 = arith.constant 0 : index
    %15 = vector.load %arg2[%c0_45, %c0_46] : memref<288x32xf32, #tpu.memory_space<vmem>>, vector<288x32xf32>
    %cst_47 = arith.constant dense<0.000000e+00> : vector<128x32xf32>
    %16 = tpu.matmul %14, %15, %cst_47 {dimension_numbers = #tpu.dot_dimension_numbers<[1], [0], [0], [1], [0, 0, 1, 1], [], []>} : vector<128x288xf32>, vector<288x32xf32>, vector<128x32xf32> -> vector<128x32xf32>
    %c0_48 = arith.constant 0 : index
    %c0_49 = arith.constant 0 : index
    %17 = vector.load %arg3[%c0_48, %c0_49] : memref<1x32xf32, #tpu.memory_space<vmem>>, vector<1x32xf32>
    %18 = vector.broadcast %17 : vector<1x32xf32> to vector<128x32xf32>
    %19 = arith.addf %16, %18 : vector<128x32xf32>
    %cst_50 = arith.constant 0.000000e+00 : f32
    %20 = vector.broadcast %cst_50 : f32 to vector<128x32xf32>
    %21 = arith.maximumf %19, %20 : vector<128x32xf32>
    %22 = vector.shape_cast %21 : vector<128x32xf32> to vector<2x8x8x32xf32>
    %c0_51 = arith.constant 0 : index
    %c1_52 = arith.constant 1 : index
    %c1_53 = arith.constant 1 : index
    %c0_54 = arith.constant 0 : index
    %23 = vector.load %arg7[%c0_51, %c1_52, %c1_53, %c0_54] : memref<2x10x10x32xf32, #tpu.memory_space<vmem>>, vector<2x8x8x32xf32>
    tpu.vector_store %arg7[%c0_51, %c1_52, %c1_53, %c0_54], %22 {strides = array<i32>} : memref<2x10x10x32xf32, #tpu.memory_space<vmem>>, vector<2x8x8x32xf32>,
    %c0_55 = arith.constant 0 : index
    %c0_56 = arith.constant 0 : index
    %c0_57 = arith.constant 0 : index
    %c0_58 = arith.constant 0 : index
    %24 = vector.load %arg7[%c0_55, %c0_56, %c0_57, %c0_58] : memref<2x10x10x32xf32, #tpu.memory_space<vmem>>, vector<2x8x8x32xf32>
    %c0_59 = arith.constant 0 : index
    %c0_60 = arith.constant 0 : index
    %c1_61 = arith.constant 1 : index
    %c0_62 = arith.constant 0 : index
    %25 = vector.load %arg7[%c0_59, %c0_60, %c1_61, %c0_62] : memref<2x10x10x32xf32, #tpu.memory_space<vmem>>, vector<2x8x8x32xf32>
    %c0_63 = arith.constant 0 : index
    %c0_64 = arith.constant 0 : index
    %c2_65 = arith.constant 2 : index
    %c0_66 = arith.constant 0 : index
    %26 = vector.load %arg7[%c0_63, %c0_64, %c2_65, %c0_66] : memref<2x10x10x32xf32, #tpu.memory_space<vmem>>, vector<2x8x8x32xf32>
    %c0_67 = arith.constant 0 : index
    %c1_68 = arith.constant 1 : index
    %c0_69 = arith.constant 0 : index
    %c0_70 = arith.constant 0 : index
    %27 = vector.load %arg7[%c0_67, %c1_68, %c0_69, %c0_70] : memref<2x10x10x32xf32, #tpu.memory_space<vmem>>, vector<2x8x8x32xf32>
    %c0_71 = arith.constant 0 : index
    %c1_72 = arith.constant 1 : index
    %c1_73 = arith.constant 1 : index
    %c0_74 = arith.constant 0 : index
    %28 = vector.load %arg7[%c0_71, %c1_72, %c1_73, %c0_74] : memref<2x10x10x32xf32, #tpu.memory_space<vmem>>, vector<2x8x8x32xf32>
    %c0_75 = arith.constant 0 : index
    %c1_76 = arith.constant 1 : index
    %c2_77 = arith.constant 2 : index
    %c0_78 = arith.constant 0 : index
    %29 = vector.load %arg7[%c0_75, %c1_76, %c2_77, %c0_78] : memref<2x10x10x32xf32, #tpu.memory_space<vmem>>, vector<2x8x8x32xf32>
    %c0_79 = arith.constant 0 : index
    %c2_80 = arith.constant 2 : index
    %c0_81 = arith.constant 0 : index
    %c0_82 = arith.constant 0 : index
    %30 = vector.load %arg7[%c0_79, %c2_80, %c0_81, %c0_82] : memref<2x10x10x32xf32, #tpu.memory_space<vmem>>, vector<2x8x8x32xf32>
    %c0_83 = arith.constant 0 : index
    %c2_84 = arith.constant 2 : index
    %c1_85 = arith.constant 1 : index
    %c0_86 = arith.constant 0 : index
    %31 = vector.load %arg7[%c0_83, %c2_84, %c1_85, %c0_86] : memref<2x10x10x32xf32, #tpu.memory_space<vmem>>, vector<2x8x8x32xf32>
    %c0_87 = arith.constant 0 : index
    %c2_88 = arith.constant 2 : index
    %c2_89 = arith.constant 2 : index
    %c0_90 = arith.constant 0 : index
    %32 = vector.load %arg7[%c0_87, %c2_88, %c2_89, %c0_90] : memref<2x10x10x32xf32, #tpu.memory_space<vmem>>, vector<2x8x8x32xf32>
    %33 = tpu.concatenate %24, %25, %26, %27, %28, %29, %30, %31, %32 in 3 : vector<2x8x8x32xf32>, vector<2x8x8x32xf32>, vector<2x8x8x32xf32>, vector<2x8x8x32xf32>, vector<2x8x8x32xf32>, vector<2x8x8x32xf32>, vector<2x8x8x32xf32>, vector<2x8x8x32xf32>, vector<2x8x8x32xf32> -> vector<2x8x8x288xf32>
    %34 = vector.shape_cast %33 : vector<2x8x8x288xf32> to vector<128x288xf32>
    %c0_91 = arith.constant 0 : index
    %c0_92 = arith.constant 0 : index
    %35 = vector.load %arg4[%c0_91, %c0_92] : memref<288x32xf32, #tpu.memory_space<vmem>>, vector<288x32xf32>
    %cst_93 = arith.constant dense<0.000000e+00> : vector<128x32xf32>
    %36 = tpu.matmul %34, %35, %cst_93 {dimension_numbers = #tpu.dot_dimension_numbers<[1], [0], [0], [1], [0, 0, 1, 1], [], []>} : vector<128x288xf32>, vector<288x32xf32>, vector<128x32xf32> -> vector<128x32xf32>
    %c0_94 = arith.constant 0 : index
    %c0_95 = arith.constant 0 : index
    %37 = vector.load %arg5[%c0_94, %c0_95] : memref<1x32xf32, #tpu.memory_space<vmem>>, vector<1x32xf32>
    %38 = vector.broadcast %37 : vector<1x32xf32> to vector<128x32xf32>
    %39 = arith.addf %36, %38 : vector<128x32xf32>
    %c0_96 = arith.constant 0 : index
    %c0_97 = arith.constant 0 : index
    %c0_98 = arith.constant 0 : index
    %c0_99 = arith.constant 0 : index
    %40 = vector.load %arg1[%c0_96, %c0_97, %c0_98, %c0_99] : memref<2x8x8x32xf32, #tpu.memory_space<vmem>>, vector<2x8x8x32xf32>
    %41 = vector.shape_cast %40 : vector<2x8x8x32xf32> to vector<128x32xf32>
    %42 = arith.addf %39, %41 : vector<128x32xf32>
    %cst_100 = arith.constant 0.000000e+00 : f32
    %43 = vector.broadcast %cst_100 : f32 to vector<128x32xf32>
    %44 = arith.maximumf %42, %43 : vector<128x32xf32>
    %45 = vector.shape_cast %44 : vector<128x32xf32> to vector<2x8x8x32xf32>
    %c0_101 = arith.constant 0 : index
    %c0_102 = arith.constant 0 : index
    %c0_103 = arith.constant 0 : index
    %c0_104 = arith.constant 0 : index
    %46 = vector.load %arg6[%c0_101, %c0_102, %c0_103, %c0_104] : memref<2x8x8x32xf32, #tpu.memory_space<vmem>>, vector<2x8x8x32xf32>
    tpu.vector_store %arg6[%c0_101, %c0_102, %c0_103, %c0_104], %45 {strides = array<i32>} : memref<2x8x8x32xf32, #tpu.memory_space<vmem>>, vector<2x8x8x32xf32>,
    return
  }
  func.func @transform_0(%arg0: i32) -> (i32, i32, i32, i32) {
    %c0_i32 = arith.constant 0 : i32
    %c0_i32_0 = arith.constant 0 : i32
    %c0_i32_1 = arith.constant 0 : i32
    %c0_i32_2 = arith.constant 0 : i32
    return %arg0, %c0_i32, %c0_i32_0, %c0_i32_1 : i32, i32, i32, i32
  }
  func.func @transform_1(%arg0: i32) -> (i32, i32) {
    %c0_i32 = arith.constant 0 : i32
    %c0_i32_0 = arith.constant 0 : i32
    %c0_i32_1 = arith.constant 0 : i32
    return %c0_i32, %c0_i32_0 : i32, i32
  }
  func.func @transform_2(%arg0: i32) -> (i32, i32) {
    %c0_i32 = arith.constant 0 : i32
    %c0_i32_0 = arith.constant 0 : i32
    %c0_i32_1 = arith.constant 0 : i32
    return %c0_i32, %c0_i32_0 : i32, i32
  }
  func.func @transform_3(%arg0: i32) -> (i32, i32) {
    %c0_i32 = arith.constant 0 : i32
    %c0_i32_0 = arith.constant 0 : i32
    %c0_i32_1 = arith.constant 0 : i32
    return %c0_i32, %c0_i32_0 : i32, i32
  }
  func.func @transform_4(%arg0: i32) -> (i32, i32) {
    %c0_i32 = arith.constant 0 : i32
    %c0_i32_0 = arith.constant 0 : i32
    %c0_i32_1 = arith.constant 0 : i32
    return %c0_i32, %c0_i32_0 : i32, i32
  }
  func.func @transform_5(%arg0: i32) -> (i32, i32, i32, i32) {
    %c0_i32 = arith.constant 0 : i32
    %c0_i32_0 = arith.constant 0 : i32
    %c0_i32_1 = arith.constant 0 : i32
    %c0_i32_2 = arith.constant 0 : i32
    return %arg0, %c0_i32, %c0_i32_0, %c0_i32_1 : i32, i32, i32, i32
  }
}

</mosaic_0001>

<bundles_post_ra>
// kernel: tpu_custom_call.1
= control target key start
LH: loop header
LB: loop body
LE: loop exit
PB: predicated region body
PF: predicated region fallthrough
CT: control target
= control target key end

     0   :  { %vm21_vm0 = vcmask 261120   ;;  %vm23_vm1 = vcmask 254976   ;;  %v3115_v2 = vmov 0.0   ;;  %s3116_s12 = smov 32   ;;  %s3117_s13 = smov 96   ;;  %s4330_s0 = inlined_call_operand.vmem [shape: f32[2,8,8,32], index: 0, kind: input, shape index: {}]   ;;  %s4331_s1 = inlined_call_operand.vmem [shape: f32[288,32], index: 1, kind: input, shape index: {}]   ;;  %s4332_s2 = inlined_call_operand.vmem [shape: f32[1,32], index: 2, kind: input, shape index: {}]   ;;  %s4333_s3 = inlined_call_operand.vmem [shape: f32[288,32], index: 3, kind: input, shape index: {}]   ;;  %s4334_s4 = inlined_call_operand.vmem [shape: f32[1,32], index: 4, kind: input, shape index: {}]   ;;  %s4335_s5 = inlined_call_operand.hbm [shape: f32[2,8,8,32], index: 5, kind: output, shape index: {}]  }
   0x1   :  { %v63_v0 = vld [vmem:[%s4330_s0] sm:$0xff]  ;;  %v64_v1 = vld [vmem:[%s4330_s0 + $0x8] sm:$0xff]  ;;  %22 = vst.msk [vmem:[#allocation2] sm:$0xff] %vm21_vm0, %v3115_v2  ;;  %25 = vst.msk [vmem:[#allocation2 + $0x10] sm:$0xff] %vm21_vm0, %v3115_v2  ;;  %s3118_s14 = smov 64  }
   0x2   :  { %24 = vst.msk [vmem:[#allocation2 + $0x8] sm:$0x3] %vm23_vm1, %v3115_v2  ;;  %26 = vst.msk [vmem:[#allocation2 + $0x18] sm:$0x3] %vm23_vm1, %v3115_v2  ;;  %v65_v3 = vld [vmem:[%s4330_s0 + $0x10] sm:$0xff]  ;;  %v66_v4 = vld [vmem:[%s4330_s0 + $0x18] sm:$0xff] }
   0x3   :  { %27 = vst.msk [vmem:[#allocation2 + $0x20] sm:$0xff] %vm21_vm0, %v3115_v2  ;;  %29 = vst.msk [vmem:[#allocation2 + $0x30] sm:$0xff] %vm21_vm0, %v3115_v2  ;;  %v67_v5 = vld [vmem:[%s4330_s0 + $0x20] sm:$0xff]  ;;  %v68_v6 = vld [vmem:[%s4330_s0 + $0x28] sm:$0xff] }
   0x4   :  { %28 = vst.msk [vmem:[#allocation2 + $0x28] sm:$0x3] %vm23_vm1, %v3115_v2  ;;  %30 = vst.msk [vmem:[#allocation2 + $0x38] sm:$0x3] %vm23_vm1, %v3115_v2  ;;  %v69_v7 = vld [vmem:[%s4330_s0 + $0x30] sm:$0xff]  ;;  %v70_v8 = vld [vmem:[%s4330_s0 + $0x38] sm:$0xff] }
   0x5   :  { %31 = vst.msk [vmem:[#allocation2 + $0x40] sm:$0xff] %vm21_vm0, %v3115_v2  ;;  %33 = vst.msk [vmem:[#allocation2 + $0x50] sm:$0xff] %vm21_vm0, %v3115_v2  ;;  %v71_v9 = vld [vmem:[%s4330_s0 + $0x40] sm:$0xff]  ;;  %v72_v10 = vld [vmem:[%s4330_s0 + $0x48] sm:$0xff] }
   0x6   :  { %32 = vst.msk [vmem:[#allocation2 + $0x48] sm:$0x3] %vm23_vm1, %v3115_v2  ;;  %34 = vst.msk [vmem:[#allocation2 + $0x58] sm:$0x3] %vm23_vm1, %v3115_v2  ;;  %v73_v11 = vld [vmem:[%s4330_s0 + $0x50] sm:$0xff]  ;;  %v74_v12 = vld [vmem:[%s4330_s0 + $0x58] sm:$0xff] }
   0x7   :  { %35 = vst.msk [vmem:[#allocation2 + $0x60] sm:$0xff] %vm21_vm0, %v3115_v2  ;;  %37 = vst.msk [vmem:[#allocation2 + $0x70] sm:$0xff] %vm21_vm0, %v3115_v2  ;;  %v75_v13 = vld [vmem:[%s4330_s0 + $0x60] sm:$0xff]  ;;  %v76_v14 = vld [vmem:[%s4330_s0 + $0x68] sm:$0xff] }
   0x8   :  { %36 = vst.msk [vmem:[#allocation2 + $0x68] sm:$0x3] %vm23_vm1, %v3115_v2  ;;  %38 = vst.msk [vmem:[#allocation2 + $0x78] sm:$0x3] %vm23_vm1, %v3115_v2  ;;  %v77_v15 = vld [vmem:[%s4330_s0 + $0x70] sm:$0xff]  ;;  %v78_v16 = vld [vmem:[%s4330_s0 + $0x78] sm:$0xff] }
   0x9   :  { %39 = vst.msk [vmem:[#allocation2 + $0x80] sm:$0xff] %vm21_vm0, %v3115_v2  ;;  %41 = vst.msk [vmem:[#allocation2 + $0x90] sm:$0xff] %vm21_vm0, %v3115_v2  ;;  %v739_v17 = vld [vmem:[%s4331_s1 + $0x80] sm:$0xff]  ;;  %v740_v18 = vld [vmem:[%s4331_s1 + $0x88] sm:$0xff] }
   0xa   :  { %40 = vst.msk [vmem:[#allocation2 + $0x88] sm:$0x3] %vm23_vm1, %v3115_v2  ;;  %42 = vst.msk [vmem:[#allocation2 + $0x98] sm:$0x3] %vm23_vm1, %v3115_v2  ;;  %v723_v19 = vld [vmem:[%s4331_s1] sm:$0xff]  ;;  %v724_v20 = vld [vmem:[%s4331_s1 + $0x8] sm:$0xff]  ;;  %v2519_v21 = vpack.c.bf16 %v740_v18, %v739_v17 }
   0xb   :  { %43 = vst.msk [vmem:[#allocation2 + $0xa0] sm:$0xff] %vm21_vm0, %v3115_v2  ;;  %45 = vst.msk [vmem:[#allocation2 + $0xb0] sm:$0xff] %vm21_vm0, %v3115_v2  ;;  %v2521_v22 = vpack.c.bf16 %v724_v20, %v723_v19  ;;  %v741_v23 = vld [vmem:[%s4331_s1 + $0x90] sm:$0xff]  ;;  %v742_v24 = vld [vmem:[%s4331_s1 + $0x98] sm:$0xff] }
   0xc   :  { %44 = vst.msk [vmem:[#allocation2 + $0xa8] sm:$0x3] %vm23_vm1, %v3115_v2  ;;  %46 = vst.msk [vmem:[#allocation2 + $0xb8] sm:$0x3] %vm23_vm1, %v3115_v2  ;;  %v112_v25 = vld [vmem:[#allocation2 + $0x1] sm:$0xff]  ;;  %v2523_v27 = vpack.c.bf16 %v742_v24, %v741_v23  ;;  %2520 = vmatprep.subr.bf16.mxu0 %v2519_v21  ;;  %v725_v50 = vld [vmem:[%s4331_s1 + $0x10] sm:$0xff] }
   0xd   :  { %47 = vst.msk [vmem:[#allocation2 + $0xc0] sm:$0xff] %vm21_vm0, %v3115_v2  ;;  %49 = vst.msk [vmem:[#allocation2 + $0xd0] sm:$0xff] %vm21_vm0, %v3115_v2  ;;  %v128_v26 = vld [vmem:[#allocation2 + $0x2] sm:$0xff]  ;;  %2522 = vmatpush3.bf16.msra.mxu0 %v2521_v22  ;;  %v726_v53 = vld [vmem:[%s4331_s1 + $0x18] sm:$0xff] }
   0xe   :  { %48 = vst.msk [vmem:[#allocation2 + $0xc8] sm:$0x3] %vm23_vm1, %v3115_v2  ;;  %50 = vst.msk [vmem:[#allocation2 + $0xd8] sm:$0x3] %vm23_vm1, %v3115_v2  ;;  %2524 = vmatprep.subr.bf16.mxu0 %v2523_v27  ;;  %v2525_v54 = vpack.c.bf16 %v726_v53, %v725_v50  ;;  %v743_v55 = vld [vmem:[%s4331_s1 + $0xa0] sm:$0xff]  ;;  %v744_v56 = vld [vmem:[%s4331_s1 + $0xa8] sm:$0xff] }
   0xf   :  { %51 = vst.msk [vmem:[#allocation2 + $0xe0] sm:$0xff] %vm21_vm0, %v3115_v2  ;;  %53 = vst.msk [vmem:[#allocation2 + $0xf0] sm:$0xff] %vm21_vm0, %v3115_v2  ;;  %v727_v57 = vld [vmem:[%s4331_s1 + $0x20] sm:$0xff]  ;;  %v2527_v60 = vpack.c.bf16 %v744_v56, %v743_v55  ;;  %v728_v61 = vld [vmem:[%s4331_s1 + $0x28] sm:$0xff] }
  0x10   :  { %52 = vst.msk [vmem:[#allocation2 + $0xe8] sm:$0x3] %vm23_vm1, %v3115_v2  ;;  %54 = vst.msk [vmem:[#allocation2 + $0xf8] sm:$0x3] %vm23_vm1, %v3115_v2  ;;  %v745_v62 = vld [vmem:[%s4331_s1 + $0xb0] sm:$0xff]  ;;  %v750_v17 = vld [vmem:[%s4331_s1 + $0xd8] sm:$0xff] }
  0x11   :  { %55 = vst.msk [vmem:[#allocation2 + $0x100] sm:$0xff] %vm21_vm0, %v3115_v2  ;;  %57 = vst.msk [vmem:[#allocation2 + $0x110] sm:$0xff] %vm21_vm0, %v3115_v2  ;;  %2526 = vmatpush3.bf16.msra.mxu0 %v2525_v54  ;;  %v755_v18 = vld [vmem:[%s4331_s1 + $0x100] sm:$0xff]  ;;  %v756_v19 = vld [vmem:[%s4331_s1 + $0x108] sm:$0xff] }
  0x12   :  { %56 = vst.msk [vmem:[#allocation2 + $0x108] sm:$0x3] %vm23_vm1, %v3115_v2  ;;  %58 = vst.msk [vmem:[#allocation2 + $0x118] sm:$0x3] %vm23_vm1, %v3115_v2  ;;  %2528 = vmatprep.subr.bf16.mxu0 %v2527_v60  ;;  %v2551_v23 = vpack.c.bf16 %v756_v19, %v755_v18  ;;  %v757_v24 = vld [vmem:[%s4331_s1 + $0x110] sm:$0xff]  ;;  %v758_v27 = vld [vmem:[%s4331_s1 + $0x118] sm:$0xff] }
  0x13   :  { %59 = vst.msk [vmem:[#allocation2 + $0x120] sm:$0xff] %vm21_vm0, %v3115_v2  ;;  %61 = vst.msk [vmem:[#allocation2 + $0x130] sm:$0xff] %vm21_vm0, %v3115_v2 }
  0x14   :  { %60 = vst.msk [vmem:[#allocation2 + $0x128] sm:$0x3] %vm23_vm1, %v3115_v2  ;;  %62 = vst.msk [vmem:[#allocation2 + $0x138] sm:$0x3] %vm23_vm1, %v3115_v2  ;;  %v746_v2 = vld [vmem:[%s4331_s1 + $0xb8] sm:$0xff] }
  0x15   :  { %80 = vst.msk [vmem:[#allocation2 + $0x11] sm:$0xff] %vm21_vm0, %v63_v0  ;;  %81 = vst.msk [vmem:[#allocation2 + $0x21] sm:$0xff] %vm21_vm0, %v64_v1  ;;  %v2529_v1 = vpack.c.bf16 %v728_v61, %v727_v57 }
  0x16   :  { %82 = vst.msk [vmem:[#allocation2 + $0x31] sm:$0xff] %vm21_vm0, %v65_v3  ;;  %83 = vst.msk [vmem:[#allocation2 + $0x41] sm:$0xff] %vm21_vm0, %v66_v4  ;;  %v2531_v3 = vpack.c.bf16 %v746_v2, %v745_v62  ;;  %v729_v4 = vld [vmem:[%s4331_s1 + $0x30] sm:$0xff] }
  0x17   :  { %84 = vst.msk [vmem:[#allocation2 + $0x51] sm:$0xff] %vm21_vm0, %v67_v5  ;;  %85 = vst.msk [vmem:[#allocation2 + $0x61] sm:$0xff] %vm21_vm0, %v68_v6  ;;  %v730_v5 = vld [vmem:[%s4331_s1 + $0x38] sm:$0xff]  ;;  %v747_v6 = vld [vmem:[%s4331_s1 + $0xc0] sm:$0xff]  ;;  %2530 = vmatpush3.bf16.msra.mxu0 %v2529_v1 }
  0x18   :  { %86 = vst.msk [vmem:[#allocation2 + $0x71] sm:$0xff] %vm21_vm0, %v69_v7  ;;  %87 = vst.msk [vmem:[#allocation2 + $0x81] sm:$0xff] %vm21_vm0, %v70_v8  ;;  %v748_v7 = vld [vmem:[%s4331_s1 + $0xc8] sm:$0xff]  ;;  %2532 = vmatprep.subr.bf16.mxu0 %v2531_v3 }
  0x19   :  { %88 = vst.msk [vmem:[#allocation2 + $0xb1] sm:$0xff] %vm21_vm0, %v71_v9  ;;  %89 = vst.msk [vmem:[#allocation2 + $0xc1] sm:$0xff] %vm21_vm0, %v72_v10 }
  0x1a   :  { %90 = vst.msk [vmem:[#allocation2 + $0xd1] sm:$0xff] %vm21_vm0, %v73_v11  ;;  %91 = vst.msk [vmem:[#allocation2 + $0xe1] sm:$0xff] %vm21_vm0, %v74_v12  ;;  %v2533_v12 = vpack.c.bf16 %v730_v5, %v729_v4 }
  0x1b   :  { %92 = vst.msk [vmem:[#allocation2 + $0xf1] sm:$0xff] %vm21_vm0, %v75_v13  ;;  %93 = vst.msk [vmem:[#allocation2 + $0x101] sm:$0xff] %vm21_vm0, %v76_v14  ;;  %v2535_v13 = vpack.c.bf16 %v748_v7, %v747_v6  ;;  %v731_v14 = vld [vmem:[%s4331_s1 + $0x40] sm:$0xff] }
  0x1c   :  { %94 = vst.msk [vmem:[#allocation2 + $0x111] sm:$0xff] %vm21_vm0, %v77_v15  ;;  %95 = vst.msk [vmem:[#allocation2 + $0x121] sm:$0xff] %vm21_vm0, %v78_v16  ;;  %v176_v28 = vld [vmem:[#allocation2 + $0x12] sm:$0xff]  ;;  %v3276_v30 = vld [vmem:[#allocation2 + $0x21] sm:$0xff]  ;;  %2534 = vmatpush3.bf16.msra.mxu0 %v2533_v12 }
  0x1d   :  { %v3274_v29 = vld [vmem:[#allocation2 + $0x10] sm:$0xff]  ;;  %v2610_v31 = vpack.i.bf16 %v112_v25, %v176_v28  ;;  %v3280_v33 = vld [vmem:[#allocation2 + $0x20] sm:$0xff]  ;;  %v732_v15 = vld [vmem:[%s4331_s1 + $0x48] sm:$0xff] }
  0x1e   :  { %v2620_v32 = vpack.i.bf16 %v3274_v29, %v3276_v30  ;;  %v3282_v34 = vld [vmem:[#allocation2 + $0x11] sm:$0xff]  ;;  %v177_v35 = vld [vmem:[#allocation2 + $0x22] sm:$0xff]  ;;  %v2615_v36 = vpack.i.bf16 %v128_v26, %v3280_v33  ;;  %v2537_v26 = vpack.c.bf16 %v732_v15, %v731_v14 }
  0x1f   :  { %2463 = vmatprep.mubr.msk.f32.mxu1 %vm21_vm0, %v177_v35  ;;  %2611 = vrot.lane.b32.xlu0 %v2610_v31, %s3116_s12  ;;  %v2625_v37 = vpack.i.bf16 %v3282_v34, %v177_v35  ;;  %v3289_v38 = vld [vmem:[#allocation2 + $0x30] sm:$0xff]  ;;  %v3300_v43 = vld [vmem:[#allocation2 + $0x40] sm:$0xff] }
  0x20   :  { %2621 = vrot.lane.b32.xlu1 %v2620_v32, %s3117_s13  ;;  %v3291_v39 = vld [vmem:[#allocation2 + $0x31] sm:$0xff]  ;;  %v2630_v40 = vpack.i.bf16 %v176_v28, %v3289_v38  ;;  %v2645_v45 = vpack.i.bf16 %v177_v35, %v3300_v43  ;;  %v3307_v46 = vld [vmem:[#allocation2 + $0x41] sm:$0xff] }
  0x21   :  { %v2635_v41 = vpack.i.bf16 %v3280_v33, %v3291_v39  ;;  %v3298_v42 = vld [vmem:[#allocation2 + $0x32] sm:$0xff]  ;;  %v3309_v47 = vld [vmem:[#allocation2 + $0x42] sm:$0xff]  ;;  %v2650_v48 = vpack.i.bf16 %v3289_v38, %v3307_v46 }
  0x22   :  { %v2640_v44 = vpack.i.bf16 %v3276_v30, %v3298_v42  ;;  %v2655_v49 = vpack.i.bf16 %v3291_v39, %v3309_v47  ;;  %v3320_v51 = vld [vmem:[#allocation2 + $0x50] sm:$0xff]  ;;  %v3350_v0 = vld [vmem:[#allocation2 + $0x60] sm:$0xff] }
  0x23   :  { %2616 = vrot.lane.b32.xlu0 %v2615_v36, %s3118_s14  ;;  %v3322_v52 = vld [vmem:[#allocation2 + $0x51] sm:$0xff]  ;;  %v2660_v58 = vpack.i.bf16 %v3298_v42, %v3320_v51  ;;  %v2675_v9 = vpack.i.bf16 %v3309_v47, %v3350_v0  ;;  %v3373_v10 = vld [vmem:[#allocation2 + $0x61] sm:$0xff] }
  0x24   :  { %2626 = vrot.lane.b32.xlu1 %v2625_v37, %s3116_s12  ;;  %v2665_v59 = vpack.i.bf16 %v3300_v43, %v3322_v52  ;;  %v3348_v63 = vld [vmem:[#allocation2 + $0x52] sm:$0xff]  ;;  %v3375_v11 = vld [vmem:[#allocation2 + $0x62] sm:$0xff]  ;;  %v2680_v20 = vpack.i.bf16 %v3320_v51, %v3373_v10 }
  0x25   :  { %v2670_v8 = vpack.i.bf16 %v3307_v46, %v3348_v63  ;;  %v749_v16 = vld [vmem:[%s4331_s1 + $0xd0] sm:$0xff]  ;;  %v2685_v21 = vpack.i.bf16 %v3322_v52, %v3375_v11 }
  0x26   :  { %v3401_v22 = vld [vmem:[#allocation2 + $0x70] sm:$0xff] }
  0x27   :  { %2631 = vrot.lane.b32.xlu0 %v2630_v40, %s3118_s14  ;;  %v3406_v25 = vld [vmem:[#allocation2 + $0x71] sm:$0xff] }
  0x28   :  { %2636 = vrot.lane.b32.xlu1 %v2635_v41, %s3117_s13 }
  0x2b   :  { %2641 = vrot.lane.b32.xlu0 %v2640_v44, %s3116_s12 }
  0x2c   :  { %2646 = vrot.lane.b32.xlu1 %v2645_v45, %s3118_s14 }
  0x2f   :  { %2651 = vrot.lane.b32.xlu0 %v2650_v48, %s3117_s13 }
  0x30   :  { %2656 = vrot.lane.b32.xlu1 %v2655_v49, %s3116_s12 }
  0x33   :  { %2661 = vrot.lane.b32.xlu0 %v2660_v58, %s3118_s14 }
  0x34   :  { %2666 = vrot.lane.b32.xlu1 %v2665_v59, %s3117_s13 }
  0x37   :  { %2671 = vrot.lane.b32.xlu0 %v2670_v8, %s3116_s12 }
  0x38   :  { %2676 = vrot.lane.b32.xlu1 %v2675_v9, %s3118_s14 }
  0x39   :  { %10 = vsyncpa [#allocation4], 0  ;;  %2536 = vmatprep.subr.bf16.mxu0 %v2535_v13  ;;  %v2539_v28 = vpack.c.bf16 %v750_v17, %v749_v16  ;;  %v733_v31 = vld [vmem:[%s4331_s1 + $0x50] sm:$0xff]  ;;  %v734_v32 = vld [vmem:[%s4331_s1 + $0x58] sm:$0xff]  ;;  %2552 = vmatprep.subr.bf16.mxu1 %v2551_v23  ;;  %v2555_v35 = vpack.c.bf16 %v758_v27, %v757_v24  ;;  %v2690_v40 = vpack.i.bf16 %v3348_v63, %v3401_v22  ;;  %vm641_vm2 = vcmask 523264   ;;  %s3119_s9 = smov [#allocation3]  }
  0x3a   :  { %v751_v36 = vld [vmem:[%s4331_s1 + $0xe0] sm:$0xff]  ;;  %v752_v37 = vld [vmem:[%s4331_s1 + $0xe8] sm:$0xff]  ;;  %2554 = vmatpush3.bf16.msra.mxu1 %v2551_v23  ;;  %v2695_v41 = vpack.i.bf16 %v3350_v0, %v3406_v25  ;;  %v182_v44 = vld [vmem:[#allocation2 + $0x72] sm:$0xff]  ;;  %2538 = vmatpush3.bf16.msra.mxu0 %v2537_v26  ;;  %v2541_v48 = vpack.c.bf16 %v734_v32, %v733_v31  ;;  %vm658_vm3 = vcmask 785408   ;;  %s2210_s10 = sshll.u32 %s3119_s9, 4  ;;  %s2211_s10 = int_to_ptr.vmem [resolvable:$true] %s2210_s10 }
  0x3b   :  { %2681 = vrot.lane.b32.xlu0 %v2680_v20, %s3117_s13  ;;  %v199_v45 = vld [vmem:[#allocation2 + $0x80] sm:$0xff]  ;;  %2556 = vmatprep.subr.bf16.mxu1 %v2555_v35  ;;  %v2543_v49 = vpack.c.bf16 %v752_v37, %v751_v36  ;;  %v736_v53 = vld [vmem:[%s4331_s1 + $0x68] sm:$0xff]  ;;  %v753_v54 = vld [vmem:[%s4331_s1 + $0xf0] sm:$0xff]  ;;  %v2700_v56 = vpack.i.bf16 %v3373_v10, %v182_v44  ;;  %s3091_s11 = scalar_lea.vmem %s2211_s10, 2048  ;;  %p3096_p1 = scmp.lt.s32.totalorder %s2211_s10, %s2211_s10 }
  0x3c   :  { %2686 = vrot.lane.b32.xlu1 %v2685_v21, %s3116_s12  ;;  %2540 = vmatprep.subr.bf16.mxu0 %v2539_v28  ;;  %v735_v50 = vld [vmem:[%s4331_s1 + $0x60] sm:$0xff]  ;;  %v754_v55 = vld [vmem:[%s4331_s1 + $0xf8] sm:$0xff]  ;;  %v2705_v57 = vpack.i.bf16 %v3375_v11, %v199_v45  ;;  %v737_v62 = vld [vmem:[%s4331_s1 + $0x70] sm:$0xff]  ;;  %p3092_p0 = scmp.ne.s32.totalorder %s2211_s10, %s3091_s11  ;;  %p3097_p2 = scmp.lt.s32.totalorder %s3091_s11, %s3091_s11 }
  0x3d   :  { %v3445_v58 = vld [vmem:[#allocation2 + $0x81] sm:$0xff]  ;;  %v2545_v60 = vpack.c.bf16 %v736_v53, %v735_v50  ;;  %v2547_v61 = vpack.c.bf16 %v754_v55, %v753_v54  ;;  %v738_v1 = vld [vmem:[%s4331_s1 + $0x78] sm:$0xff]  ;;  %v200_v4 = vld [vmem:[#allocation2 + $0x90] sm:$0xff] }
  0x3e   :  { %2558 = vmatpush3.bf16.msra.mxu1 %v2555_v35  ;;  %v183_v59 = vld [vmem:[#allocation2 + $0x82] sm:$0xff]  ;;  %2542 = vmatpush3.bf16.msra.mxu0 %v2541_v48  ;;  %v2710_v2 = vpack.i.bf16 %v3401_v22, %v3445_v58  ;;  %v216_v5 = vld [vmem:[#allocation2 + $0x91] sm:$0xff]  ;;  %v2549_v6 = vpack.c.bf16 %v738_v1, %v737_v62  ;;  %p3098_p3 = por %p3097_p2, %p3096_p1 }
  0x3f   :  { %2691 = vrot.lane.b32.xlu0 %v2690_v40, %s3118_s14  ;;  %2544 = vmatprep.subr.bf16.mxu0 %v2543_v49  ;;  %v2715_v3 = vpack.i.bf16 %v3406_v25, %v183_v59  ;;  %v120_v7 = vld [vmem:[#allocation2 + $0xa1] sm:$0xff]  ;;  %v184_v8 = vld [vmem:[#allocation2 + $0xb2] sm:$0xff] }
  0x40   :  { %2696 = vrot.lane.b32.xlu1 %v2695_v41, %s3117_s13  ;;  %v136_v9 = vld [vmem:[#allocation2 + $0xa2] sm:$0xff]  ;;  %v3475_v14 = vld [vmem:[#allocation2 + $0xb0] sm:$0xff]  ;;  %p3099_p4 = pnand %p3098_p3, %p3092_p0 }
  0x41   :  { %2464 = vmatmul.mubr.msk.f32.vlgmr.msra.gmra.mrb[0].mxu1 %vm21_vm0, %v3298_v42  ;;  %v2720_v42 = vpack.i.bf16 %v182_v44, %v200_v4  ;;  %v3468_v12 = vld [vmem:[#allocation2 + $0xc0] sm:$0xff]  ;;  %v3479_v16 = vld [vmem:[#allocation2 + $0xb1] sm:$0xff] }
  0x42   :  { %2466 = vmatprep.mubr.msk.f32.mxu1 %vm21_vm0, %v3309_v47  ;;  %2546 = vmatpush3.bf16.msra.mxu0 %v2545_v60  ;;  %v2725_v47 = vpack.i.bf16 %v199_v45, %v216_v5  ;;  %v2735_v13 = vpack.i.bf16 %v136_v9, %v3468_v12  ;;  %v3477_v15 = vld [vmem:[#allocation2 + $0xc1] sm:$0xff]  ;;  %v3488_v20 = vld [vmem:[#allocation2 + $0xd0] sm:$0xff] }
  0x43   :  { %2701 = vrot.lane.b32.xlu0 %v2700_v56, %s3116_s12  ;;  %2548 = vmatprep.subr.bf16.mxu0 %v2547_v61  ;;  %v185_v17 = vld [vmem:[#allocation2 + $0xc2] sm:$0xff]  ;;  %v2740_v18 = vpack.i.bf16 %v3475_v14, %v3477_v15  ;;  %v3490_v21 = vld [vmem:[#allocation2 + $0xd1] sm:$0xff]  ;;  %v2750_v26 = vpack.i.bf16 %v184_v8, %v3488_v20 }
  0x44   :  { %2706 = vrot.lane.b32.xlu1 %v2705_v57, %s3118_s14  ;;  %v2745_v19 = vpack.i.bf16 %v3479_v16, %v185_v17  ;;  %v186_v23 = vld [vmem:[#allocation2 + $0xd2] sm:$0xff]  ;;  %v187_v24 = vld [vmem:[#allocation2 + $0xe2] sm:$0xff]  ;;  %v2755_v27 = vpack.i.bf16 %v3468_v12, %v3490_v21 }
  0x45   :  { %2467 = vmatmul.mubr.msk.f32.gmra.mrb[2].mxu1 %vm21_vm0, %v3348_v63  ;;  %v232_v63 = vld [vmem:[#allocation2 + $0x92] sm:$0xff]  ;;  %v3499_v28 = vld [vmem:[#allocation2 + $0xe0] sm:$0xff]  ;;  %v2760_v35 = vpack.i.bf16 %v3477_v15, %v186_v23  ;;  %v2775_v45 = vpack.i.bf16 %v3490_v21, %v187_v24 }
  0x46   :  { %2469 = vmatprep.mubr.msk.f32.mxu1 %vm21_vm0, %v3375_v11  ;;  %2550 = vmatpush3.bf16.msra.mxu0 %v2549_v6  ;;  %v2730_v11 = vpack.i.bf16 %v120_v7, %v184_v8  ;;  %v188_v31 = vld [vmem:[#allocation2 + $0xf2] sm:$0xff]  ;;  %v189_v32 = vld [vmem:[#allocation2 + $0x102] sm:$0xff]  ;;  %v2765_v36 = vpack.i.bf16 %v185_v17, %v3499_v28 }
  0x47   :  { %2711 = vrot.lane.b32.xlu0 %v2710_v2, %s3117_s13  ;;  %v3507_v37 = vld [vmem:[#allocation2 + $0xe1] sm:$0xff]  ;;  %v190_v40 = vld [vmem:[#allocation2 + $0x112] sm:$0xff] }
  0x48   :  { %2716 = vrot.lane.b32.xlu1 %v2715_v3, %s3116_s12  ;;  %v191_v41 = vld [vmem:[#allocation2 + $0x122] sm:$0xff]  ;;  %v3516_v48 = vld [vmem:[#allocation2 + $0xf0] sm:$0xff]  ;;  %v2790_v55 = vpack.i.bf16 %v3507_v37, %v188_v31 }
  0x49   :  { %2470 = vmatmul.mubr.msk.f32.gmra.mrb[4].mxu1 %vm21_vm0, %v182_v44  ;;  %v2770_v44 = vpack.i.bf16 %v3488_v20, %v3507_v37  ;;  %v3518_v49 = vld [vmem:[#allocation2 + $0xf1] sm:$0xff]  ;;  %v2780_v50 = vpack.i.bf16 %v186_v23, %v3516_v48  ;;  %v3525_v54 = vld [vmem:[#allocation2 + $0x100] sm:$0xff] }
  0x4a   :  { %2472 = vmatprep.mubr.msk.f32.mxu1 %vm21_vm0, %v183_v59  ;;  %v2785_v53 = vpack.i.bf16 %v3499_v28, %v3518_v49  ;;  %v2795_v56 = vpack.i.bf16 %v187_v24, %v3525_v54  ;;  %v3531_v57 = vld [vmem:[#allocation2 + $0x101] sm:$0xff]  ;;  %v2805_v60 = vpack.i.bf16 %v3518_v49, %v189_v32  ;;  %v3538_v61 = vld [vmem:[#allocation2 + $0x110] sm:$0xff] }
  0x4b   :  { %2721 = vrot.lane.b32.xlu0 %v2720_v42, %s3118_s14  ;;  %v2800_v59 = vpack.i.bf16 %v3516_v48, %v3531_v57  ;;  %v3540_v62 = vld [vmem:[#allocation2 + $0x111] sm:$0xff]  ;;  %v2810_v1 = vpack.i.bf16 %v188_v31, %v3538_v61  ;;  %v207_v3 = vld [vmem:[#allocation2 + $0x120] sm:$0xff]  ;;  %v2820_v5 = vpack.i.bf16 %v3531_v57, %v190_v40 }
  0x4c   :  { %2726 = vrot.lane.b32.xlu1 %v2725_v47, %s3117_s13  ;;  %v2815_v2 = vpack.i.bf16 %v3525_v54, %v3540_v62  ;;  %v240_v4 = vld [vmem:[#allocation2 + $0x132] sm:$0xff]  ;;  %v2825_v6 = vpack.i.bf16 %v189_v32, %v207_v3  ;;  %v3550_v42 = vld [vmem:[#allocation2 + $0x121] sm:$0xff]  ;;  %v2835_v7 = vpack.i.bf16 %v3540_v62, %v191_v41 }
  0x4d   :  { %2473 = vmatmul.mubr.msk.f32.gmra.mrb[6].mxu1 %vm21_vm0, %v232_v63  ;;  %v2830_v47 = vpack.i.bf16 %v3538_v61, %v3550_v42  ;;  %v208_v8 = vld [vmem:[#allocation2 + $0x130] sm:$0xff] }
  0x4e   :  { %2475 = vmatprep.mubr.msk.f32.mxu1 %vm21_vm0, %v185_v17  ;;  %v224_v9 = vld [vmem:[#allocation2 + $0x131] sm:$0xff]  ;;  %v2840_v63 = vpack.i.bf16 %v190_v40, %v208_v8 }
  0x4f   :  { %2731 = vrot.lane.b32.xlu0 %v2730_v11, %s3116_s12  ;;  %v2845_v11 = vpack.i.bf16 %v207_v3, %v224_v9 }
  0x50   :  { %2736 = vrot.lane.b32.xlu1 %v2735_v13, %s3118_s14 }
  0x51   :  { %2476 = vmatmul.mubr.msk.f32.gmra.mrb[8].mxu1 %vm21_vm0, %v186_v23  ;;  %v96_v23 = vld [vmem:[#allocation2] sm:$0xff] }
  0x52   :  { %2478 = vmatprep.mubr.msk.f32.mxu1 %vm21_vm0, %v187_v24 }
  0x53   :  { %2741 = vrot.lane.b32.xlu0 %v2740_v18, %s3117_s13 }
  0x54   :  { %2746 = vrot.lane.b32.xlu1 %v2745_v19, %s3116_s12 }
  0x55   :  { %2479 = vmatmul.mubr.msk.f32.gmra.mrb[10].mxu1 %vm21_vm0, %v188_v31 }
  0x56   :  { %2481 = vmatprep.mubr.msk.f32.mxu1 %vm21_vm0, %v189_v32 }
  0x57   :  { %2751 = vrot.lane.b32.xlu0 %v2750_v26, %s3118_s14 }
  0x58   :  { %2756 = vrot.lane.b32.xlu1 %v2755_v27, %s3117_s13 }
  0x59   :  { %2482 = vmatmul.mubr.msk.f32.gmra.mrb[12].mxu1 %vm21_vm0, %v190_v40 }
  0x5a   :  { %2484 = vmatprep.mubr.msk.f32.mxu1 %vm21_vm0, %v191_v41 }
  0x5b   :  { %2761 = vrot.lane.b32.xlu0 %v2760_v35, %s3116_s12 }
  0x5c   :  { %2766 = vrot.lane.b32.xlu1 %v2765_v36, %s3118_s14 }
  0x5d   :  { %2485 = vmatmul.mubr.msk.f32.gmra.mrb[14].mxu1 %vm21_vm0, %v240_v4 }
  0x5f   :  { %2771 = vrot.lane.b32.xlu0 %v2770_v44, %s3117_s13 }
  0x60   :  { %2776 = vrot.lane.b32.xlu1 %v2775_v45, %s3116_s12 }
  0x63   :  { %2781 = vrot.lane.b32.xlu0 %v2780_v50, %s3118_s14 }
  0x64   :  { %2786 = vrot.lane.b32.xlu1 %v2785_v53, %s3117_s13 }
  0x67   :  { %2791 = vrot.lane.b32.xlu0 %v2790_v55, %s3116_s12 }
  0x68   :  { %2796 = vrot.lane.b32.xlu1 %v2795_v56, %s3118_s14 }
  0x6b   :  { %2801 = vrot.lane.b32.xlu0 %v2800_v59, %s3117_s13 }
  0x6c   :  { %2806 = vrot.lane.b32.xlu1 %v2805_v60, %s3116_s12 }
  0x6f   :  { %2811 = vrot.lane.b32.xlu0 %v2810_v1, %s3118_s14 }
  0x70   :  { %2816 = vrot.lane.b32.xlu1 %v2815_v2, %s3117_s13 }
  0x73   :  { %2821 = vrot.lane.b32.xlu0 %v2820_v5, %s3116_s12 }
  0x74   :  { %2826 = vrot.lane.b32.xlu1 %v2825_v6, %s3118_s14 }
  0x77   :  { %2831 = vrot.lane.b32.xlu0 %v2830_v47, %s3117_s13 }
  0x78   :  { %2836 = vrot.lane.b32.xlu1 %v2835_v7, %s3116_s12 }
  0x7b   :  { %2841 = vrot.lane.b32.xlu0 %v2840_v63, %s3118_s14 }
  0x7c   :  { %2846 = vrot.lane.b32.xlu1 %v2845_v11, %s3117_s13 }
  0x91   :  { %v2612_v13 = vpop.permute.xlu0 %2611 }
  0x92   :  { %v2622_v17 = vpop.permute.xlu1 %2621  ;;  %v2614_v18 = vunpack.i.h.bf16 %v2612_v13  ;;  %v2613_v19 = vunpack.i.l.bf16 %v2612_v13 }
  0x93   :  { %v2624_v27 = vunpack.i.h.bf16 %v2622_v17  ;;  %v2623_v31 = vunpack.i.l.bf16 %v2622_v17 }
  0x94   :  { %v675_v41 = vsel %vm21_vm0, %v3282_v34, %v2613_v19  ;;  %v625_v44 = vsel %vm21_vm0, %v96_v23, %v2614_v18 }
  0x95   :  { %v2617_v24 = vpop.permute.xlu0 %2616 }
  0x96   :  { %v2627_v26 = vpop.permute.xlu1 %2626  ;;  %v2619_v32 = vunpack.i.h.bf16 %v2617_v24  ;;  %v2618_v35 = vunpack.i.l.bf16 %v2617_v24 }
  0x97   :  { %v2629_v36 = vunpack.i.h.bf16 %v2627_v26  ;;  %v2628_v40 = vunpack.i.l.bf16 %v2627_v26 }
  0x98   :  { %v691_v45 = vsel %vm641_vm2, %v675_v41, %v2618_v35  ;;  %v642_v50 = vsel %vm641_vm2, %v625_v44, %v2619_v32 }
  0x99   :  { %v2632_v53 = vpop.permute.xlu0 %2631  ;;  %v707_v56 = vsel %vm658_vm3, %v691_v45, %v2623_v31  ;;  %v659_v59 = vsel %vm658_vm3, %v642_v50, %v2624_v27  ;;  %v676_v34 = vsel %vm21_vm0, %v3276_v30, %v2628_v40  ;;  %v626_v4 = vsel %vm21_vm0, %v3274_v29, %v2629_v36 }
  0x9a   :  { %v2637_v55 = vpop.permute.xlu1 %2636  ;;  %v2634_v60 = vunpack.i.h.bf16 %v2632_v53  ;;  %v2633_v1 = vunpack.i.l.bf16 %v2632_v53  ;;  %878 = vmatprep.mubr.f32.mxu0 %v707_v56 }
  0x9b   :  { %v2639_v2 = vunpack.i.h.bf16 %v2637_v55  ;;  %v2638_v3 = vunpack.i.l.bf16 %v2637_v55  ;;  %879 = vmatmul.mubr.f32.vlgmr.msra.gmra.mrb[0].mxu0 %v659_v59 }
  0x9c   :  { %v692_v5 = vsel %vm641_vm2, %v676_v34, %v2633_v1  ;;  %v643_v6 = vsel %vm641_vm2, %v626_v4, %v2634_v60 }
  0x9d   :  { %v2642_v47 = vpop.permute.xlu0 %2641  ;;  %v708_v8 = vsel %vm658_vm3, %v692_v5, %v2638_v3  ;;  %v660_v9 = vsel %vm658_vm3, %v643_v6, %v2639_v2 }
  0x9e   :  { %v2647_v7 = vpop.permute.xlu1 %2646  ;;  %v2644_v63 = vunpack.i.h.bf16 %v2642_v47  ;;  %v2643_v11 = vunpack.i.l.bf16 %v2642_v47  ;;  %883 = vmatprep.mubr.f32.mxu0 %v708_v8 }
  0x9f   :  { %v2649_v13 = vunpack.i.h.bf16 %v2647_v7  ;;  %v2648_v17 = vunpack.i.l.bf16 %v2647_v7  ;;  %884 = vmatmul.mubr.f32.gmra.mrb[2].mxu0 %v660_v9 }
  0xa0   :  { %v677_v30 = vsel %vm21_vm0, %v3291_v39, %v2643_v11  ;;  %v627_v29 = vsel %vm21_vm0, %v3280_v33, %v2644_v63 }
  0xa1   :  { %v2652_v18 = vpop.permute.xlu0 %2651  ;;  %v693_v31 = vsel %vm641_vm2, %v677_v30, %v2648_v17  ;;  %v644_v32 = vsel %vm641_vm2, %v627_v29, %v2649_v13 }
  0xa2   :  { %v2657_v19 = vpop.permute.xlu1 %2656  ;;  %v2654_v23 = vunpack.i.h.bf16 %v2652_v18  ;;  %v2653_v24 = vunpack.i.l.bf16 %v2652_v18 }
  0xa3   :  { %v2659_v26 = vunpack.i.h.bf16 %v2657_v19  ;;  %v2658_v27 = vunpack.i.l.bf16 %v2657_v19 }
  0xa4   :  { %v709_v35 = vsel %vm658_vm3, %v693_v31, %v2653_v24  ;;  %v661_v36 = vsel %vm658_vm3, %v644_v32, %v2654_v23 }
  0xa5   :  { %v2662_v40 = vpop.permute.xlu0 %2661  ;;  %888 = vmatprep.mubr.f32.mxu0 %v709_v35  ;;  %v678_v50 = vsel %vm21_vm0, %v3307_v46, %v2658_v27  ;;  %v628_v53 = vsel %vm21_vm0, %v3289_v38, %v2659_v26 }
  0xa6   :  { %v2667_v39 = vpop.permute.xlu1 %2666  ;;  %v2664_v41 = vunpack.i.h.bf16 %v2662_v40  ;;  %v2663_v44 = vunpack.i.l.bf16 %v2662_v40  ;;  %889 = vmatmul.mubr.f32.gmra.mrb[4].mxu0 %v661_v36 }
  0xa7   :  { %v2669_v33 = vunpack.i.h.bf16 %v2667_v39  ;;  %v2668_v45 = vunpack.i.l.bf16 %v2667_v39 }
  0xa8   :  { %v694_v55 = vsel %vm641_vm2, %v678_v50, %v2663_v44  ;;  %v645_v56 = vsel %vm641_vm2, %v628_v53, %v2664_v41 }
  0xa9   :  { %v2672_v59 = vpop.permute.xlu0 %2671  ;;  %v710_v1 = vsel %vm658_vm3, %v694_v55, %v2668_v45  ;;  %v662_v2 = vsel %vm658_vm3, %v645_v56, %v2669_v33 }
  0xaa   :  { %v2677_v60 = vpop.permute.xlu1 %2676  ;;  %v2674_v3 = vunpack.i.h.bf16 %v2672_v59  ;;  %v2673_v34 = vunpack.i.l.bf16 %v2672_v59  ;;  %893 = vmatprep.mubr.f32.mxu0 %v710_v1 }
  0xab   :  { %v2679_v4 = vunpack.i.h.bf16 %v2677_v60  ;;  %v2678_v5 = vunpack.i.l.bf16 %v2677_v60  ;;  %894 = vmatmul.mubr.f32.gmra.mrb[6].mxu0 %v662_v2 }
  0xac   :  { %v679_v46 = vsel %vm21_vm0, %v3322_v52, %v2673_v34  ;;  %v629_v38 = vsel %vm21_vm0, %v3300_v43, %v2674_v3 }
  0xad   :  { %v2682_v6 = vpop.permute.xlu0 %2681  ;;  %v695_v11 = vsel %vm641_vm2, %v679_v46, %v2678_v5  ;;  %v646_v13 = vsel %vm641_vm2, %v629_v38, %v2679_v4 }
  0xae   :  { %v2687_v47 = vpop.permute.xlu1 %2686  ;;  %v2684_v7 = vunpack.i.h.bf16 %v2682_v6  ;;  %v2683_v8 = vunpack.i.l.bf16 %v2682_v6 }
  0xaf   :  { %v2689_v9 = vunpack.i.h.bf16 %v2687_v47  ;;  %v2688_v63 = vunpack.i.l.bf16 %v2687_v47 }
  0xb0   :  { %v711_v17 = vsel %vm658_vm3, %v695_v11, %v2683_v8  ;;  %v663_v30 = vsel %vm658_vm3, %v646_v13, %v2684_v7  ;;  %v104_v13 = vld [vmem:[#allocation2 + $0xa0] sm:$0xff] }
  0xb1   :  { %v2692_v29 = vpop.permute.xlu0 %2691  ;;  %898 = vmatprep.mubr.f32.mxu0 %v711_v17  ;;  %v680_v24 = vsel %vm21_vm0, %v3373_v10, %v2688_v63  ;;  %v630_v26 = vsel %vm21_vm0, %v3320_v51, %v2689_v9 }
  0xb2   :  { %v2697_v52 = vpop.permute.xlu1 %2696  ;;  %v2694_v18 = vunpack.i.h.bf16 %v2692_v29  ;;  %v2693_v19 = vunpack.i.l.bf16 %v2692_v29  ;;  %899 = vmatmul.mubr.f32.gmra.mrb[8].mxu0 %v663_v30 }
  0xb3   :  { %v2699_v43 = vunpack.i.h.bf16 %v2697_v52  ;;  %v2698_v23 = vunpack.i.l.bf16 %v2697_v52 }
  0xb4   :  { %v696_v27 = vsel %vm641_vm2, %v680_v24, %v2693_v19  ;;  %v647_v31 = vsel %vm641_vm2, %v630_v26, %v2694_v18 }
  0xb5   :  { %v2702_v32 = vpop.permute.xlu0 %2701  ;;  %v712_v36 = vsel %vm658_vm3, %v696_v27, %v2698_v23  ;;  %v664_v40 = vsel %vm658_vm3, %v647_v31, %v2699_v43 }
  0xb6   :  { %v2707_v35 = vpop.permute.xlu1 %2706  ;;  %v2704_v39 = vunpack.i.h.bf16 %v2702_v32  ;;  %v2703_v41 = vunpack.i.l.bf16 %v2702_v32  ;;  %903 = vmatprep.mubr.f32.mxu0 %v712_v36 }
  0xb7   :  { %v2709_v44 = vunpack.i.h.bf16 %v2707_v35  ;;  %v2708_v33 = vunpack.i.l.bf16 %v2707_v35  ;;  %904 = vmatmul.mubr.f32.gmra.mrb[10].mxu0 %v664_v40 }
  0xb8   :  { %v681_v10 = vsel %vm21_vm0, %v3406_v25, %v2703_v41  ;;  %v631_v51 = vsel %vm21_vm0, %v3350_v0, %v2704_v39 }
  0xb9   :  { %v2712_v45 = vpop.permute.xlu0 %2711  ;;  %v697_v60 = vsel %vm641_vm2, %v681_v10, %v2708_v33  ;;  %v648_v1 = vsel %vm641_vm2, %v631_v51, %v2709_v44 }
  0xba   :  { %v2717_v50 = vpop.permute.xlu1 %2716  ;;  %v2714_v53 = vunpack.i.h.bf16 %v2712_v45  ;;  %v2713_v55 = vunpack.i.l.bf16 %v2712_v45 }
  0xbb   :  { %v2719_v56 = vunpack.i.h.bf16 %v2717_v50  ;;  %v2718_v59 = vunpack.i.l.bf16 %v2717_v50 }
  0xbc   :  { %v713_v2 = vsel %vm658_vm3, %v697_v60, %v2713_v55  ;;  %v665_v3 = vsel %vm658_vm3, %v648_v1, %v2714_v53 }
  0xbd   :  { %v2722_v34 = vpop.permute.xlu0 %2721  ;;  %908 = vmatprep.mubr.f32.mxu0 %v713_v2  ;;  %v682_v38 = vsel %vm21_vm0, %v3445_v58, %v2718_v59  ;;  %v632_v6 = vsel %vm21_vm0, %v3401_v22, %v2719_v56 }
  0xbe   :  { %v2727_v25 = vpop.permute.xlu1 %2726  ;;  %v2724_v4 = vunpack.i.h.bf16 %v2722_v34  ;;  %v2723_v5 = vunpack.i.l.bf16 %v2722_v34  ;;  %909 = vmatmul.mubr.f32.gmra.mrb[12].mxu0 %v665_v3 }
  0xbf   :  { %v2729_v0 = vunpack.i.h.bf16 %v2727_v25  ;;  %v2728_v46 = vunpack.i.l.bf16 %v2727_v25 }
  0xc0   :  { %v698_v47 = vsel %vm641_vm2, %v682_v38, %v2723_v5  ;;  %v649_v7 = vsel %vm641_vm2, %v632_v6, %v2724_v4 }
  0xc1   :  { %v2732_v8 = vpop.permute.xlu0 %2731  ;;  %v714_v63 = vsel %vm658_vm3, %v698_v47, %v2728_v46  ;;  %v666_v11 = vsel %vm658_vm3, %v649_v7, %v2729_v0 }
  0xc2   :  { %v2737_v9 = vpop.permute.xlu1 %2736  ;;  %v2734_v17 = vunpack.i.h.bf16 %v2732_v8  ;;  %v2733_v30 = vunpack.i.l.bf16 %v2732_v8  ;;  %913 = vmatprep.mubr.f32.mxu0 %v714_v63 }
  0xc3   :  { %v2739_v29 = vunpack.i.h.bf16 %v2737_v9  ;;  %v2738_v52 = vunpack.i.l.bf16 %v2737_v9  ;;  %914 = vmatmul.mubr.f32.gmra.mrb[14].mxu0 %v666_v11 }
  0xc4   :  { %v683_v22 = vsel %vm21_vm0, %v3479_v16, %v2733_v30  ;;  %v633_v58 = vsel %vm21_vm0, %v104_v13, %v2734_v17 }
  0xc5   :  { %v2742_v18 = vpop.permute.xlu0 %2741  ;;  %v699_v27 = vsel %vm641_vm2, %v683_v22, %v2738_v52  ;;  %v650_v31 = vsel %vm641_vm2, %v633_v58, %v2739_v29 }
  0xc6   :  { %v2747_v19 = vpop.permute.xlu1 %2746  ;;  %v2744_v43 = vunpack.i.h.bf16 %v2742_v18  ;;  %v2743_v23 = vunpack.i.l.bf16 %v2742_v18 }
  0xc7   :  { %v2749_v24 = vunpack.i.h.bf16 %v2747_v19  ;;  %v2748_v26 = vunpack.i.l.bf16 %v2747_v19 }
  0xc8   :  { %v715_v32 = vsel %vm658_vm3, %v699_v27, %v2743_v23  ;;  %v667_v35 = vsel %vm658_vm3, %v650_v31, %v2744_v43 }
  0xc9   :  { %v2752_v36 = vpop.permute.xlu0 %2751  ;;  %918 = vmatprep.mubr.f32.mxu0 %v715_v32  ;;  %v684_v33 = vsel %vm21_vm0, %v3477_v15, %v2748_v26  ;;  %v634_v10 = vsel %vm21_vm0, %v3475_v14, %v2749_v24 }
  0xca   :  { %v2757_v40 = vpop.permute.xlu1 %2756  ;;  %v2754_v16 = vunpack.i.h.bf16 %v2752_v36  ;;  %v2753_v39 = vunpack.i.l.bf16 %v2752_v36  ;;  %919 = vmatmul.mubr.f32.gmra.mrb[16].mxu0 %v667_v35 }
  0xcb   :  { %v2759_v41 = vunpack.i.h.bf16 %v2757_v40  ;;  %v2758_v44 = vunpack.i.l.bf16 %v2757_v40 }
  0xcc   :  { %v700_v51 = vsel %vm641_vm2, %v684_v33, %v2753_v39  ;;  %v651_v45 = vsel %vm641_vm2, %v634_v10, %v2754_v16 }
  0xcd   :  { %v2762_v50 = vpop.permute.xlu0 %2761  ;;  %v716_v55 = vsel %vm658_vm3, %v700_v51, %v2758_v44  ;;  %v668_v56 = vsel %vm658_vm3, %v651_v45, %v2759_v41 }
  0xce   :  { %v2767_v53 = vpop.permute.xlu1 %2766  ;;  %v2764_v59 = vunpack.i.h.bf16 %v2762_v50  ;;  %v2763_v60 = vunpack.i.l.bf16 %v2762_v50  ;;  %923 = vmatprep.mubr.f32.mxu0 %v716_v55 }
  0xcf   :  { %v2769_v1 = vunpack.i.h.bf16 %v2767_v53  ;;  %v2768_v2 = vunpack.i.l.bf16 %v2767_v53  ;;  %924 = vmatmul.mubr.f32.gmra.mrb[18].mxu0 %v668_v56 }
  0xd0   :  { %v685_v15 = vsel %vm21_vm0, %v3490_v21, %v2763_v60  ;;  %v635_v14 = vsel %vm21_vm0, %v3468_v12, %v2764_v59 }
  0xd1   :  { %v2772_v3 = vpop.permute.xlu0 %2771  ;;  %v701_v46 = vsel %vm641_vm2, %v685_v15, %v2768_v2  ;;  %v652_v38 = vsel %vm641_vm2, %v635_v14, %v2769_v1 }
  0xd2   :  { %v2777_v34 = vpop.permute.xlu1 %2776  ;;  %v2774_v25 = vunpack.i.h.bf16 %v2772_v3  ;;  %v2773_v4 = vunpack.i.l.bf16 %v2772_v3 }
  0xd3   :  { %v2779_v5 = vunpack.i.h.bf16 %v2777_v34  ;;  %v2778_v0 = vunpack.i.l.bf16 %v2777_v34 }
  0xd4   :  { %v717_v6 = vsel %vm658_vm3, %v701_v46, %v2773_v4  ;;  %v669_v47 = vsel %vm658_vm3, %v652_v38, %v2774_v25 }
  0xd5   :  { %v2782_v7 = vpop.permute.xlu0 %2781  ;;  %928 = vmatprep.mubr.f32.mxu0 %v717_v6  ;;  %v686_v11 = vsel %vm21_vm0, %v3507_v37, %v2778_v0  ;;  %v636_v13 = vsel %vm21_vm0, %v3488_v20, %v2779_v5 }
  0xd6   :  { %v2787_v21 = vpop.permute.xlu1 %2786  ;;  %v2784_v8 = vunpack.i.h.bf16 %v2782_v7  ;;  %v2783_v9 = vunpack.i.l.bf16 %v2782_v7  ;;  %929 = vmatmul.mubr.f32.gmra.mrb[20].mxu0 %v669_v47 }
  0xd7   :  { %v2789_v12 = vunpack.i.h.bf16 %v2787_v21  ;;  %v2788_v63 = vunpack.i.l.bf16 %v2787_v21 }
  0xd8   :  { %v702_v17 = vsel %vm641_vm2, %v686_v11, %v2783_v9  ;;  %v653_v30 = vsel %vm641_vm2, %v636_v13, %v2784_v8 }
  0xd9   :  { %v2792_v29 = vpop.permute.xlu0 %2791  ;;  %v718_v22 = vsel %vm658_vm3, %v702_v17, %v2788_v63  ;;  %v670_v58 = vsel %vm658_vm3, %v653_v30, %v2789_v12 }
  0xda   :  { %v2797_v52 = vpop.permute.xlu1 %2796  ;;  %v2794_v18 = vunpack.i.h.bf16 %v2792_v29  ;;  %v2793_v19 = vunpack.i.l.bf16 %v2792_v29  ;;  %933 = vmatprep.mubr.f32.mxu0 %v718_v22  ;;  %v1792_v29 = vld [vmem:[%s4333_s3 + $0x100] sm:$0xff]  ;;  %v1795_v22 = vld [vmem:[%s4333_s3 + $0x118] sm:$0xff] }
  0xdb   :  { %v2799_v43 = vunpack.i.h.bf16 %v2797_v52  ;;  %v2798_v23 = vunpack.i.l.bf16 %v2797_v52  ;;  %934 = vmatmul.mubr.f32.gmra.mrb[22].mxu0 %v670_v58 }
  0xdc   :  { %v687_v37 = vsel %vm21_vm0, %v3518_v49, %v2793_v19  ;;  %v637_v20 = vsel %vm21_vm0, %v3499_v28, %v2794_v18 }
  0xdd   :  { %v2802_v24 = vpop.permute.xlu0 %2801  ;;  %v703_v36 = vsel %vm641_vm2, %v687_v37, %v2798_v23  ;;  %v654_v40 = vsel %vm641_vm2, %v637_v20, %v2799_v43 }
  0xde   :  { %v2807_v26 = vpop.permute.xlu1 %2806  ;;  %v2804_v27 = vunpack.i.h.bf16 %v2802_v24  ;;  %v2803_v31 = vunpack.i.l.bf16 %v2802_v24 }
  0xdf   :  { %v2809_v32 = vunpack.i.h.bf16 %v2807_v26  ;;  %v2808_v35 = vunpack.i.l.bf16 %v2807_v26 }
  0xe0   :  { %v719_v16 = vsel %vm658_vm3, %v703_v36, %v2803_v31  ;;  %v671_v39 = vsel %vm658_vm3, %v654_v40, %v2804_v27 }
  0xe1   :  { %v2812_v41 = vpop.permute.xlu0 %2811  ;;  %938 = vmatprep.mubr.f32.mxu0 %v719_v16  ;;  %v688_v51 = vsel %vm21_vm0, %v3531_v57, %v2808_v35  ;;  %v638_v45 = vsel %vm21_vm0, %v3516_v48, %v2809_v32 }
  0xe2   :  { %v2817_v49 = vpop.permute.xlu1 %2816  ;;  %v2814_v44 = vunpack.i.h.bf16 %v2812_v41  ;;  %v2813_v33 = vunpack.i.l.bf16 %v2812_v41  ;;  %939 = vmatmul.mubr.f32.gmra.mrb[24].mxu0 %v671_v39  ;;  %v1776_v41 = vld [vmem:[%s4333_s3 + $0x80] sm:$0xff] }
  0xe3   :  { %v2819_v28 = vunpack.i.h.bf16 %v2817_v49  ;;  %v2818_v10 = vunpack.i.l.bf16 %v2817_v49  ;;  %v1777_v49 = vld [vmem:[%s4333_s3 + $0x88] sm:$0xff] }
  0xe4   :  { %v704_v50 = vsel %vm641_vm2, %v688_v51, %v2813_v33  ;;  %v655_v53 = vsel %vm641_vm2, %v638_v45, %v2814_v44  ;;  %v2559_v44 = vpack.c.bf16 %v1777_v49, %v1776_v41  ;;  %v1760_v33 = vld [vmem:[%s4333_s3] sm:$0xff]  ;;  %v1778_v51 = vld [vmem:[%s4333_s3 + $0x90] sm:$0xff]  ;;  %v1779_v45 = vld [vmem:[%s4333_s3 + $0x98] sm:$0xff] }
  0xe5   :  { %v2822_v55 = vpop.permute.xlu0 %2821  ;;  %v720_v59 = vsel %vm658_vm3, %v704_v50, %v2818_v10  ;;  %v672_v60 = vsel %vm658_vm3, %v655_v53, %v2819_v28  ;;  %v1761_v28 = vld [vmem:[%s4333_s3 + $0x8] sm:$0xff]  ;;  %v2563_v50 = vpack.c.bf16 %v1779_v45, %v1778_v51  ;;  %v1762_v53 = vld [vmem:[%s4333_s3 + $0x10] sm:$0xff] }
  0xe6   :  { %v2827_v56 = vpop.permute.xlu1 %2826  ;;  %v2824_v1 = vunpack.i.h.bf16 %v2822_v55  ;;  %v2823_v2 = vunpack.i.l.bf16 %v2822_v55  ;;  %943 = vmatprep.mubr.f32.mxu0 %v720_v59  ;;  %v2561_v10 = vpack.c.bf16 %v1761_v28, %v1760_v33  ;;  %2560 = vmatprep.subr.bf16.mxu1 %v2559_v44  ;;  %v1763_v55 = vld [vmem:[%s4333_s3 + $0x18] sm:$0xff]  ;;  %v1780_v59 = vld [vmem:[%s4333_s3 + $0xa0] sm:$0xff]  ;;  %v1789_v41 = vld [vmem:[%s4333_s3 + $0xe8] sm:$0xff] }
  0xe7   :  { %v2829_v15 = vunpack.i.h.bf16 %v2827_v56  ;;  %v2828_v14 = vunpack.i.l.bf16 %v2827_v56  ;;  %944 = vmatmul.mubr.f32.gmra.mrb[26].mxu0 %v672_v60  ;;  %v2565_v56 = vpack.c.bf16 %v1763_v55, %v1762_v53  ;;  %v1781_v60 = vld [vmem:[%s4333_s3 + $0xa8] sm:$0xff]  ;;  %v1772_v44 = vld [vmem:[%s4333_s3 + $0x60] sm:$0xff]  ;;  %v1790_v45 = vld [vmem:[%s4333_s3 + $0xf0] sm:$0xff] }
  0xe8   :  { %v689_v57 = vsel %vm21_vm0, %v3540_v62, %v2823_v2  ;;  %v639_v48 = vsel %vm21_vm0, %v3525_v54, %v2824_v1  ;;  %2562 = vmatpush3.bf16.msra.mxu1 %v2561_v10  ;;  %v1764_v1 = vld [vmem:[%s4333_s3 + $0x20] sm:$0xff]  ;;  %v2567_v2 = vpack.c.bf16 %v1781_v60, %v1780_v59  ;;  %v1773_v33 = vld [vmem:[%s4333_s3 + $0x68] sm:$0xff] }
  0xe9   :  { %v2832_v3 = vpop.permute.xlu0 %2831  ;;  %v705_v46 = vsel %vm641_vm2, %v689_v57, %v2828_v14  ;;  %v656_v38 = vsel %vm641_vm2, %v639_v48, %v2829_v15  ;;  %2564 = vmatprep.subr.bf16.mxu1 %v2563_v50  ;;  %v1765_v15 = vld [vmem:[%s4333_s3 + $0x28] sm:$0xff]  ;;  %v1782_v14 = vld [vmem:[%s4333_s3 + $0xb0] sm:$0xff]  ;;  %v1783_v57 = vld [vmem:[%s4333_s3 + $0xb8] sm:$0xff]  ;;  %v2585_v10 = vpack.c.bf16 %v1773_v33, %v1772_v44 }
  0xea   :  { %v2837_v34 = vpop.permute.xlu1 %2836  ;;  %v2834_v25 = vunpack.i.h.bf16 %v2832_v3  ;;  %v2833_v4 = vunpack.i.l.bf16 %v2832_v3  ;;  %v2569_v48 = vpack.c.bf16 %v1765_v15, %v1764_v1  ;;  %v2571_v3 = vpack.c.bf16 %v1783_v57, %v1782_v14  ;;  %v1791_v50 = vld [vmem:[%s4333_s3 + $0xf8] sm:$0xff]  ;;  %v1152_v14 = vld [vmem:[#allocation2 + $0x1] sm:$0xff] }
  0xeb   :  { %v2839_v5 = vunpack.i.h.bf16 %v2837_v34  ;;  %v2838_v0 = vunpack.i.l.bf16 %v2837_v34  ;;  %v1766_v34 = vld [vmem:[%s4333_s3 + $0x30] sm:$0xff]  ;;  %v2587_v55 = vpack.c.bf16 %v1791_v50, %v1790_v45 }
  0xec   :  { %v721_v6 = vsel %vm658_vm3, %v705_v46, %v2833_v4  ;;  %v673_v47 = vsel %vm658_vm3, %v656_v38, %v2834_v25  ;;  %2566 = vmatpush3.bf16.msra.mxu1 %v2565_v56  ;;  %v1767_v25 = vld [vmem:[%s4333_s3 + $0x38] sm:$0xff]  ;;  %v1784_v4 = vld [vmem:[%s4333_s3 + $0xc0] sm:$0xff]  ;;  %v1774_v56 = vld [vmem:[%s4333_s3 + $0x70] sm:$0xff] }
  0xed   :  { %v2842_v7 = vpop.permute.xlu0 %2841  ;;  %948 = vmatprep.mubr.f32.mxu0 %v721_v6  ;;  %v690_v12 = vsel %vm21_vm0, %v3550_v42, %v2838_v0  ;;  %v640_v63 = vsel %vm21_vm0, %v3538_v61, %v2839_v5  ;;  %v1793_v42 = vld [vmem:[%s4333_s3 + $0x108] sm:$0xff]  ;;  %v1794_v61 = vld [vmem:[%s4333_s3 + $0x110] sm:$0xff]  ;;  %2568 = vmatprep.subr.bf16.mxu1 %v2567_v2  ;;  %v2573_v0 = vpack.c.bf16 %v1767_v25, %v1766_v34  ;;  %v1768_v38 = vld [vmem:[%s4333_s3 + $0x40] sm:$0xff] }
  0xee   :  { %v2847_v62 = vpop.permute.xlu1 %2846  ;;  %v2844_v21 = vunpack.i.h.bf16 %v2842_v7  ;;  %v2843_v8 = vunpack.i.l.bf16 %v2842_v7  ;;  %949 = vmatmul.mubr.f32.gmra.mrb[28].mxu0 %v673_v47  ;;  %v3694_v52 = vpack.c.bf16 %v1793_v42, %v1792_v29  ;;  %v3704_v58 = vpack.c.bf16 %v1795_v22, %v1794_v61  ;;  %v1785_v5 = vld [vmem:[%s4333_s3 + $0xc8] sm:$0xff]  ;;  %v1786_v47 = vld [vmem:[%s4333_s3 + $0xd0] sm:$0xff]  ;;  %v1787_v7 = vld [vmem:[%s4333_s3 + $0xd8] sm:$0xff] }
  0xef   :  { %v2849_v54 = vunpack.i.h.bf16 %v2847_v62  ;;  %v2848_v9 = vunpack.i.l.bf16 %v2847_v62  ;;  %v2575_v46 = vpack.c.bf16 %v1785_v5, %v1784_v4  ;;  %v1769_v6 = vld [vmem:[%s4333_s3 + $0x48] sm:$0xff]  ;;  %v1788_v22 = vld [vmem:[%s4333_s3 + $0xe0] sm:$0xff] }
  0xf0   :  { %v706_v11 = vsel %vm641_vm2, %v690_v12, %v2843_v8  ;;  %v657_v13 = vsel %vm641_vm2, %v640_v63, %v2844_v21  ;;  %2592 = vmatprep.subr.bf16.mxu0 %v3694_v52  ;;  %2570 = vmatpush3.bf16.msra.mxu1 %v2569_v48  ;;  %v2577_v62 = vpack.c.bf16 %v1769_v6, %v1768_v38  ;;  %v1770_v8 = vld [vmem:[%s4333_s3 + $0x50] sm:$0xff]  ;;  %v3815_v63 = vld [vmem:[%s4332_s2] ss:$0 sm:$0xff] }
  0xf1   :  { %v722_v17 = vsel %vm658_vm3, %v706_v11, %v2848_v9  ;;  %v674_v30 = vsel %vm658_vm3, %v657_v13, %v2849_v54  ;;  %2594 = vmatpush3.bf16.msra.mxu0 %v3694_v52  ;;  %2572 = vmatprep.subr.bf16.mxu1 %v2571_v3  ;;  %v2579_v21 = vpack.c.bf16 %v1787_v7, %v1786_v47  ;;  %v1771_v54 = vld [vmem:[%s4333_s3 + $0x58] sm:$0xff] }
  0xf2   :  { %953 = vmatprep.mubr.f32.mxu0 %v722_v17  ;;  %2596 = vmatprep.subr.bf16.mxu0 %v3704_v58  ;;  %v2581_v13 = vpack.c.bf16 %v1771_v54, %v1770_v8  ;;  %v2583_v49 = vpack.c.bf16 %v1789_v41, %v1788_v22 }
  0xf3   :  { %954 = vmatmul.mubr.f32.gmra.mrb[30].mxu0 %v674_v30 }
  0xf4   :  { %2574 = vmatpush3.bf16.msra.mxu1 %v2573_v0  ;;  %v1168_v0 = vld [vmem:[#allocation2 + $0x2] sm:$0xff] }
  0xf5   :  { %2598 = vmatpush3.bf16.msra.mxu0 %v3704_v58  ;;  %2576 = vmatprep.subr.bf16.mxu1 %v2575_v46 }
  0xf8   :  { %2578 = vmatpush3.bf16.msra.mxu1 %v2577_v62 }
  0xf9   :  { %2580 = vmatprep.subr.bf16.mxu1 %v2579_v21 }
  0xfc   :  { %2582 = vmatpush3.bf16.msra.mxu1 %v2581_v13 }
  0xfd   :  { %2584 = vmatprep.subr.bf16.mxu1 %v2583_v49 }
 0x100   :  { %2586 = vmatpush3.bf16.msra.mxu1 %v2585_v10 }
 0x101   :  { %2588 = vmatprep.subr.bf16.mxu1 %v2587_v55 }
 0x114   :  { %v3708_v18 = vpop.f32.mrb[0].mxu1 }
 0x115   :  { %v3710_v19 = vpop.f32.mrb[1].mxu1 }
 0x118   :  { %v3712_v43 = vpop.f32.mrb[2].mxu1 }
 0x119   :  { %v3714_v23 = vpop.f32.mrb[3].mxu1 }
 0x11c   :  { %v3716_v37 = vpop.f32.mrb[4].mxu1 }
 0x11d   :  { %v3718_v20 = vpop.f32.mrb[5].mxu1 }
 0x120   :  { %v3720_v24 = vpop.f32.mrb[6].mxu1 }
 0x121   :  { %v3722_v26 = vpop.f32.mrb[7].mxu1 }
 0x124   :  { %v3724_v27 = vpop.f32.mrb[8].mxu1 }
 0x125   :  { %v3726_v31 = vpop.f32.mrb[9].mxu1 }
 0x128   :  { %v3728_v32 = vpop.f32.mrb[10].mxu1 }
 0x129   :  { %v3730_v35 = vpop.f32.mrb[11].mxu1 }
 0x12c   :  { %v3732_v36 = vpop.f32.mrb[12].mxu1 }
 0x12d   :  { %v3734_v40 = vpop.f32.mrb[13].mxu1 }
 0x130   :  { %v3736_v16 = vpop.f32.mrb[14].mxu1 }
 0x131   :  { %v3738_v39 = vpop.f32.mrb[15].mxu1 }
 0x16e   :  { %v2287_v9 = vpop.f32.mrb[0].mxu0 }
 0x16f   :  { %v2288_v12 = vpop.f32.mrb[1].mxu0 }
 0x170   :  { %v2289_v11 = vadd.f32 %v2288_v12, %v2287_v9 }
 0x172   :  { %v2290_v17 = vpop.f32.mrb[2].mxu0  ;;  %v881_v30 = vadd.f32 %v2289_v11, %v3815_v63 }
 0x173   :  { %v2291_v29 = vpop.f32.mrb[3].mxu0 }
 0x174   :  { %v2292_v42 = vadd.f32 %v2291_v29, %v2290_v17  ;;  %v1026_v61 = vadd.f32 %v3710_v19, %v881_v30 }
 0x176   :  { %v886_v19 = vadd.f32 %v2292_v42, %v3815_v63  ;;  %v1104_v28 = vmax.f32 %v1026_v61, 0.0 }
 0x178   :  { %v1031_v51 = vadd.f32 %v3708_v18, %v886_v19  ;;  %1120 = vst.msk [vmem:[#allocation2 + $0x11] sm:$0xff] %vm21_vm0, %v1104_v28  ;;  %v1775_v18 = vld [vmem:[%s4333_s3 + $0x78] sm:$0xff] }
 0x179   :  { %v2293_v53 = vpop.f32.mrb[4].mxu0  ;;  %v2589_v1 = vpack.c.bf16 %v1775_v18, %v1774_v56 }
 0x17a   :  { %v1105_v59 = vmax.f32 %v1031_v51, 0.0  ;;  %v2294_v60 = vpop.f32.mrb[5].mxu0 }
 0x17b   :  { %v2295_v2 = vadd.f32 %v2294_v60, %v2293_v53  ;;  %2590 = vmatpush3.bf16.msra.mxu1 %v2589_v1 }
 0x17c   :  { %1121 = vst.msk [vmem:[#allocation2 + $0x21] sm:$0xff] %vm21_vm0, %v1105_v59  ;;  %2599 = vmatprep.subr.bf16.mxu1 %v3694_v52 }
 0x17d   :  { %v891_v15 = vadd.f32 %v2295_v2, %v3815_v63 }
 0x17e   :  { %v2296_v57 = vpop.f32.mrb[6].mxu0 }
 0x17f   :  { %v1036_v48 = vadd.f32 %v3714_v23, %v891_v15  ;;  %v2297_v3 = vpop.f32.mrb[7].mxu0  ;;  %v1216_v34 = vld [vmem:[#allocation2 + $0x12] sm:$0xff] }
 0x180   :  { %v2298_v25 = vadd.f32 %v2297_v3, %v2296_v57  ;;  %v2850_v4 = vpack.i.bf16 %v1152_v14, %v1216_v34  ;;  %v3852_v38 = vld [vmem:[#allocation2 + $0x10] sm:$0xff] }
 0x181   :  { %v1106_v5 = vmax.f32 %v1036_v48, 0.0  ;;  %v3866_v11 = vld [vmem:[#allocation2 + $0x11] sm:$0xff] }
 0x182   :  { %v896_v46 = vadd.f32 %v2298_v25, %v3815_v63  ;;  %2851 = vrot.lane.b32.xlu0 %v2850_v4, %s3116_s12 }
 0x183   :  { %1122 = vst.msk [vmem:[#allocation2 + $0x31] sm:$0xff] %vm21_vm0, %v1106_v5  ;;  %v1264_v6 = vld [vmem:[#allocation2 + $0x22] sm:$0xff] }
 0x184   :  { %v3855_v47 = vld [vmem:[#allocation2 + $0x20] sm:$0xff]  ;;  %v1041_v23 = vadd.f32 %v3712_v43, %v896_v46  ;;  %2495 = vmatprep.mubr.msk.f32.mxu0 %vm21_vm0, %v1264_v6  ;;  %v2865_v43 = vpack.i.bf16 %v3866_v11, %v1264_v6 }
 0x185   :  { %v3857_v7 = vld [vmem:[#allocation2 + $0x21] sm:$0xff]  ;;  %v2855_v62 = vpack.i.bf16 %v1168_v0, %v3855_v47  ;;  %v2299_v8 = vpop.f32.mrb[8].mxu0 }
 0x186   :  { %v2860_v21 = vpack.i.bf16 %v3852_v38, %v3857_v7  ;;  %v1107_v54 = vmax.f32 %v1041_v23, 0.0  ;;  %v2300_v9 = vpop.f32.mrb[9].mxu0 }
 0x187   :  { %2856 = vrot.lane.b32.xlu1 %v2855_v62, %s3118_s14  ;;  %v2301_v12 = vadd.f32 %v2300_v9, %v2299_v8 }
 0x188   :  { %2861 = vrot.lane.b32.xlu0 %v2860_v21, %s3117_s13  ;;  %1123 = vst.msk [vmem:[#allocation2 + $0x41] sm:$0xff] %vm21_vm0, %v1107_v54 }
 0x189   :  { %v901_v13 = vadd.f32 %v2301_v12, %v3815_v63 }
 0x18a   :  { %v2302_v17 = vpop.f32.mrb[10].mxu0  ;;  %v1265_v30 = vld [vmem:[#allocation2 + $0x32] sm:$0xff] }
 0x18b   :  { %2866 = vrot.lane.b32.xlu1 %v2865_v43, %s3116_s12  ;;  %v3872_v29 = vld [vmem:[#allocation2 + $0x30] sm:$0xff]  ;;  %v1046_v61 = vadd.f32 %v3718_v20, %v901_v13  ;;  %v2303_v22 = vpop.f32.mrb[11].mxu0  ;;  %2496 = vmatmul.mubr.msk.f32.vlgmr.msra.gmra.mrb[32].mxu0 %vm21_vm0, %v1265_v30  ;;  %v2880_v20 = vpack.i.bf16 %v3857_v7, %v1265_v30 }
 0x18c   :  { %v3874_v42 = vld [vmem:[#allocation2 + $0x31] sm:$0xff]  ;;  %v2870_v41 = vpack.i.bf16 %v1216_v34, %v3872_v29  ;;  %v2304_v44 = vadd.f32 %v2303_v22, %v2302_v17 }
 0x18d   :  { %v2875_v49 = vpack.i.bf16 %v3855_v47, %v3874_v42  ;;  %v1108_v33 = vmax.f32 %v1046_v61, 0.0 }
 0x18e   :  { %2871 = vrot.lane.b32.xlu0 %v2870_v41, %s3118_s14  ;;  %v906_v19 = vadd.f32 %v2304_v44, %v3815_v63 }
 0x18f   :  { %2876 = vrot.lane.b32.xlu1 %v2875_v49, %s3117_s13  ;;  %1124 = vst.msk [vmem:[#allocation2 + $0x51] sm:$0xff] %vm21_vm0, %v1108_v33  ;;  %v1266_v28 = vld [vmem:[#allocation2 + $0x42] sm:$0xff] }
 0x190   :  { %v3886_v10 = vld [vmem:[#allocation2 + $0x40] sm:$0xff]  ;;  %v1051_v51 = vadd.f32 %v3716_v37, %v906_v19  ;;  %2498 = vmatprep.mubr.msk.f32.mxu0 %vm21_vm0, %v1266_v28  ;;  %v2895_v37 = vpack.i.bf16 %v3874_v42, %v1266_v28 }
 0x191   :  { %v2885_v45 = vpack.i.bf16 %v1264_v6, %v3886_v10  ;;  %v3891_v50 = vld [vmem:[#allocation2 + $0x41] sm:$0xff]  ;;  %v2305_v53 = vpop.f32.mrb[12].mxu0 }
 0x192   :  { %2881 = vrot.lane.b32.xlu0 %v2880_v20, %s3116_s12  ;;  %v1109_v55 = vmax.f32 %v1051_v51, 0.0  ;;  %v2306_v56 = vpop.f32.mrb[13].mxu0  ;;  %v2890_v59 = vpack.i.bf16 %v3872_v29, %v3891_v50 }
 0x193   :  { %2886 = vrot.lane.b32.xlu1 %v2885_v45, %s3118_s14  ;;  %v2307_v18 = vadd.f32 %v2306_v56, %v2305_v53 }
 0x194   :  { %1125 = vst.msk [vmem:[#allocation2 + $0x61] sm:$0xff] %vm21_vm0, %v1109_v55  ;;  %v1239_v55 = vld [vmem:[#allocation2 + $0x90] sm:$0xff] }
 0x195   :  { %v911_v60 = vadd.f32 %v2307_v18, %v3815_v63  ;;  %v3090_v18 = vld [vmem:[#allocation2 + $0x92] sm:$0xff] }
 0x196   :  { %2891 = vrot.lane.b32.xlu0 %v2890_v59, %s3117_s13  ;;  %v2308_v1 = vpop.f32.mrb[14].mxu0  ;;  %v1267_v2 = vld [vmem:[#allocation2 + $0x52] sm:$0xff] }
 0x197   :  { %2896 = vrot.lane.b32.xlu1 %v2895_v37, %s3116_s12  ;;  %v3902_v15 = vld [vmem:[#allocation2 + $0x50] sm:$0xff]  ;;  %v1056_v57 = vadd.f32 %v3722_v26, %v911_v60  ;;  %v2309_v48 = vpop.f32.mrb[15].mxu0  ;;  %2499 = vmatmul.mubr.msk.f32.gmra.mrb[34].mxu0 %vm21_vm0, %v1267_v2  ;;  %v2910_v26 = vpack.i.bf16 %v3891_v50, %v1267_v2 }
 0x198   :  { %v3904_v14 = vld [vmem:[#allocation2 + $0x51] sm:$0xff]  ;;  %v2900_v3 = vpack.i.bf16 %v1265_v30, %v3902_v15  ;;  %v2310_v25 = vadd.f32 %v2309_v48, %v2308_v1 }
 0x199   :  { %v2905_v34 = vpack.i.bf16 %v3886_v10, %v3904_v14  ;;  %v1110_v4 = vmax.f32 %v1056_v57, 0.0  ;;  %v1255_v48 = vld [vmem:[#allocation2 + $0x91] sm:$0xff] }
 0x19a   :  { %2901 = vrot.lane.b32.xlu0 %v2900_v3, %s3118_s14  ;;  %v916_v5 = vadd.f32 %v2310_v25, %v3815_v63 }
 0x19b   :  { %2906 = vrot.lane.b32.xlu1 %v2905_v34, %s3117_s13  ;;  %1126 = vst.msk [vmem:[#allocation2 + $0x71] sm:$0xff] %vm21_vm0, %v1110_v4  ;;  %v1268_v0 = vld [vmem:[#allocation2 + $0x62] sm:$0xff] }
 0x19c   :  { %v3916_v46 = vld [vmem:[#allocation2 + $0x60] sm:$0xff]  ;;  %v1061_v6 = vadd.f32 %v3720_v24, %v916_v5  ;;  %2501 = vmatprep.mubr.msk.f32.mxu0 %vm21_vm0, %v1268_v0  ;;  %v2925_v24 = vpack.i.bf16 %v3904_v14, %v1268_v0 }
 0x19d   :  { %v2915_v23 = vpack.i.bf16 %v1266_v28, %v3916_v46  ;;  %v3921_v62 = vld [vmem:[#allocation2 + $0x61] sm:$0xff]  ;;  %v2311_v21 = vpop.f32.mrb[16].mxu0 }
 0x19e   :  { %2911 = vrot.lane.b32.xlu0 %v2910_v26, %s3116_s12  ;;  %v1111_v8 = vmax.f32 %v1061_v6, 0.0  ;;  %v2312_v54 = vpop.f32.mrb[17].mxu0  ;;  %v2920_v12 = vpack.i.bf16 %v3902_v15, %v3921_v62  ;;  %v1160_v26 = vld [vmem:[#allocation2 + $0xa1] sm:$0xff] }
 0x19f   :  { %2916 = vrot.lane.b32.xlu1 %v2915_v23, %s3118_s14  ;;  %v2313_v9 = vadd.f32 %v2312_v54, %v2311_v21  ;;  %v1176_v21 = vld [vmem:[#allocation2 + $0xa2] sm:$0xff] }
 0x1a0   :  { %1127 = vst.msk [vmem:[#allocation2 + $0x81] sm:$0xff] %vm21_vm0, %v1111_v8 }
 0x1a1   :  { %v921_v43 = vadd.f32 %v2313_v9, %v3815_v63 }
 0x1a2   :  { %2921 = vrot.lane.b32.xlu0 %v2920_v12, %s3117_s13  ;;  %v2314_v13 = vpop.f32.mrb[18].mxu0  ;;  %v1269_v17 = vld [vmem:[#allocation2 + $0x72] sm:$0xff] }
 0x1a3   :  { %2926 = vrot.lane.b32.xlu1 %v2925_v24, %s3116_s12  ;;  %v3932_v30 = vld [vmem:[#allocation2 + $0x70] sm:$0xff]  ;;  %v1066_v22 = vadd.f32 %v3726_v31, %v921_v43  ;;  %v2315_v41 = vpop.f32.mrb[19].mxu0  ;;  %2502 = vmatmul.mubr.msk.f32.gmra.mrb[36].mxu0 %vm21_vm0, %v1269_v17  ;;  %v2940_v31 = vpack.i.bf16 %v3921_v62, %v1269_v17  ;;  %v2945_v1 = vpack.i.bf16 %v1269_v17, %v1239_v55 }
 0x1a4   :  { %v3934_v61 = vld [vmem:[#allocation2 + $0x71] sm:$0xff]  ;;  %v2930_v49 = vpack.i.bf16 %v1267_v2, %v3932_v30  ;;  %v2316_v33 = vadd.f32 %v2315_v41, %v2314_v13 }
 0x1a5   :  { %v2935_v44 = vpack.i.bf16 %v3916_v46, %v3934_v61  ;;  %v1112_v19 = vmax.f32 %v1066_v22, 0.0 }
 0x1a6   :  { %2931 = vrot.lane.b32.xlu0 %v2930_v49, %s3118_s14  ;;  %v926_v28 = vadd.f32 %v2316_v33, %v3815_v63 }
 0x1a7   :  { %2936 = vrot.lane.b32.xlu1 %v2935_v44, %s3117_s13  ;;  %1128 = vst.msk [vmem:[#allocation2 + $0xb1] sm:$0xff] %vm21_vm0, %v1112_v19  ;;  %v1270_v20 = vld [vmem:[#allocation2 + $0x82] sm:$0xff] }
 0x1a8   :  { %v1238_v51 = vld [vmem:[#allocation2 + $0x80] sm:$0xff]  ;;  %v1071_v45 = vadd.f32 %v3724_v27, %v926_v28  ;;  %2504 = vmatprep.mubr.msk.f32.mxu0 %vm21_vm0, %v1270_v20  ;;  %v2960_v27 = vpack.i.bf16 %v3934_v61, %v1270_v20 }
 0x1a9   :  { %v2950_v53 = vpack.i.bf16 %v1268_v0, %v1238_v51  ;;  %v2317_v56 = vpop.f32.mrb[20].mxu0  ;;  %2505 = vmatmul.mubr.msk.f32.gmra.mrb[38].mxu0 %vm21_vm0, %v3090_v18  ;;  %v3953_v2 = vld [vmem:[#allocation2 + $0x81] sm:$0xff]  ;;  %v2965_v0 = vpack.i.bf16 %v1238_v51, %v1255_v48 }
 0x1aa   :  { %2941 = vrot.lane.b32.xlu0 %v2940_v31, %s3116_s12  ;;  %v1113_v59 = vmax.f32 %v1071_v45, 0.0  ;;  %v2318_v37 = vpop.f32.mrb[21].mxu0  ;;  %v2955_v4 = vpack.i.bf16 %v3932_v30, %v3953_v2 }
 0x1ab   :  { %2951 = vrot.lane.b32.xlu1 %v2950_v53, %s3118_s14  ;;  %v2319_v60 = vadd.f32 %v2318_v37, %v2317_v56 }
 0x1ac   :  { %1129 = vst.msk [vmem:[#allocation2 + $0xc1] sm:$0xff] %vm21_vm0, %v1113_v59 }
 0x1ad   :  { %v931_v57 = vadd.f32 %v2319_v60, %v3815_v63 }
 0x1ae   :  { %2946 = vrot.lane.b32.xlu0 %v2945_v1, %s3118_s14  ;;  %v2320_v3 = vpop.f32.mrb[22].mxu0  ;;  %v1224_v6 = vld [vmem:[#allocation2 + $0xb2] sm:$0xff] }
 0x1af   :  { %2961 = vrot.lane.b32.xlu1 %v2960_v27, %s3116_s12  ;;  %v1076_v34 = vadd.f32 %v3730_v35, %v931_v57  ;;  %v2321_v25 = vpop.f32.mrb[23].mxu0  ;;  %v2970_v35 = vpack.i.bf16 %v1160_v26, %v1224_v6  ;;  %v3974_v41 = vld [vmem:[#allocation2 + $0xb0] sm:$0xff] }
 0x1b0   :  { %v2322_v5 = vadd.f32 %v2321_v25, %v2320_v3 }
 0x1b1   :  { %v1114_v23 = vmax.f32 %v1076_v34, 0.0 }
 0x1b2   :  { %2956 = vrot.lane.b32.xlu0 %v2955_v4, %s3117_s13  ;;  %v936_v8 = vadd.f32 %v2322_v5, %v3815_v63 }
 0x1b3   :  { %2966 = vrot.lane.b32.xlu1 %v2965_v0, %s3117_s13  ;;  %1130 = vst.msk [vmem:[#allocation2 + $0xd1] sm:$0xff] %vm21_vm0, %v1114_v23  ;;  %v1272_v54 = vld [vmem:[#allocation2 + $0xc2] sm:$0xff] }
 0x1b4   :  { %v3965_v9 = vld [vmem:[#allocation2 + $0xc0] sm:$0xff]  ;;  %v1081_v12 = vadd.f32 %v3728_v32, %v936_v8  ;;  %2507 = vmatprep.mubr.msk.f32.mxu0 %vm21_vm0, %v1272_v54  ;;  %v3978_v32 = vld [vmem:[#allocation2 + $0xb1] sm:$0xff] }
 0x1b5   :  { %v2975_v24 = vpack.i.bf16 %v1176_v21, %v3965_v9  ;;  %v3970_v43 = vld [vmem:[#allocation2 + $0xc1] sm:$0xff]  ;;  %v2323_v13 = vpop.f32.mrb[24].mxu0  ;;  %v2985_v33 = vpack.i.bf16 %v3978_v32, %v1272_v54 }
 0x1b6   :  { %2971 = vrot.lane.b32.xlu0 %v2970_v35, %s3116_s12  ;;  %v1115_v17 = vmax.f32 %v1081_v12, 0.0  ;;  %v2324_v22 = vpop.f32.mrb[25].mxu0  ;;  %v2980_v44 = vpack.i.bf16 %v3974_v41, %v3970_v43 }
 0x1b7   :  { %2976 = vrot.lane.b32.xlu1 %v2975_v24, %s3118_s14  ;;  %v2325_v49 = vadd.f32 %v2324_v22, %v2323_v13 }
 0x1b8   :  { %1131 = vst.msk [vmem:[#allocation2 + $0xe1] sm:$0xff] %vm21_vm0, %v1115_v17 }
 0x1b9   :  { %v941_v19 = vadd.f32 %v2325_v49, %v3815_v63 }
 0x1ba   :  { %2981 = vrot.lane.b32.xlu0 %v2980_v44, %s3117_s13  ;;  %v2326_v28 = vpop.f32.mrb[26].mxu0  ;;  %v1273_v20 = vld [vmem:[#allocation2 + $0xd2] sm:$0xff] }
 0x1bb   :  { %2986 = vrot.lane.b32.xlu1 %v2985_v33, %s3116_s12  ;;  %v3985_v31 = vld [vmem:[#allocation2 + $0xd0] sm:$0xff]  ;;  %v1086_v45 = vadd.f32 %v3734_v40, %v941_v19  ;;  %v2327_v53 = vpop.f32.mrb[27].mxu0  ;;  %2508 = vmatmul.mubr.msk.f32.gmra.mrb[40].mxu0 %vm21_vm0, %v1273_v20  ;;  %v3000_v40 = vpack.i.bf16 %v3970_v43, %v1273_v20 }
 0x1bc   :  { %v3987_v51 = vld [vmem:[#allocation2 + $0xd1] sm:$0xff]  ;;  %v2990_v55 = vpack.i.bf16 %v1224_v6, %v3985_v31  ;;  %v2328_v18 = vadd.f32 %v2327_v53, %v2326_v28 }
 0x1bd   :  { %v2995_v56 = vpack.i.bf16 %v3965_v9, %v3987_v51  ;;  %v1116_v59 = vmax.f32 %v1086_v45, 0.0 }
 0x1be   :  { %2991 = vrot.lane.b32.xlu0 %v2990_v55, %s3118_s14  ;;  %v946_v37 = vadd.f32 %v2328_v18, %v3815_v63 }
 0x1bf   :  { %2996 = vrot.lane.b32.xlu1 %v2995_v56, %s3117_s13  ;;  %1132 = vst.msk [vmem:[#allocation2 + $0xf1] sm:$0xff] %vm21_vm0, %v1116_v59  ;;  %v3999_v60 = vld [vmem:[#allocation2 + $0xe0] sm:$0xff] }
 0x1c0   :  { %v1091_v1 = vadd.f32 %v3732_v36, %v946_v37  ;;  %v3005_v27 = vpack.i.bf16 %v1272_v54, %v3999_v60  ;;  %v4003_v57 = vld [vmem:[#allocation2 + $0xe1] sm:$0xff] }
 0x1c1   :  { %v2329_v48 = vpop.f32.mrb[28].mxu0  ;;  %v4006_v3 = vld [vmem:[#allocation2 + $0xe2] sm:$0xff]  ;;  %v3010_v5 = vpack.i.bf16 %v3985_v31, %v4003_v57 }
 0x1c2   :  { %3001 = vrot.lane.b32.xlu0 %v3000_v40, %s3116_s12  ;;  %v1117_v34 = vmax.f32 %v1091_v1, 0.0  ;;  %v2330_v25 = vpop.f32.mrb[29].mxu0  ;;  %v3015_v36 = vpack.i.bf16 %v3987_v51, %v4006_v3 }
 0x1c3   :  { %3006 = vrot.lane.b32.xlu1 %v3005_v27, %s3118_s14  ;;  %v2331_v4 = vadd.f32 %v2330_v25, %v2329_v48  ;;  %v1263_v25 = vld [vmem:[#allocation2 + $0x131] sm:$0xff] }
 0x1c4   :  { %1133 = vst.msk [vmem:[#allocation2 + $0x101] sm:$0xff] %vm21_vm0, %v1117_v34  ;;  %v1247_v34 = vld [vmem:[#allocation2 + $0x130] sm:$0xff] }
 0x1c5   :  { %v951_v0 = vadd.f32 %v2331_v4, %v3815_v63 }
 0x1c6   :  { %3011 = vrot.lane.b32.xlu0 %v3010_v5, %s3117_s13  ;;  %v2332_v26 = vpop.f32.mrb[30].mxu0  ;;  %v4017_v6 = vld [vmem:[#allocation2 + $0xf0] sm:$0xff] }
 0x1c7   :  { %3016 = vrot.lane.b32.xlu1 %v3015_v36, %s3116_s12  ;;  %v4019_v23 = vld [vmem:[#allocation2 + $0xf1] sm:$0xff]  ;;  %v1096_v21 = vadd.f32 %v3738_v39, %v951_v0  ;;  %v2333_v8 = vpop.f32.mrb[31].mxu0  ;;  %v3020_v54 = vpack.i.bf16 %v1273_v20, %v4017_v6 }
 0x1c8   :  { %v3025_v35 = vpack.i.bf16 %v3999_v60, %v4019_v23  ;;  %v2334_v12 = vadd.f32 %v2333_v8, %v2332_v26  ;;  %v4025_v24 = vld [vmem:[#allocation2 + $0xf2] sm:$0xff] }
 0x1c9   :  { %v1118_v13 = vmax.f32 %v1096_v21, 0.0  ;;  %v3030_v39 = vpack.i.bf16 %v4003_v57, %v4025_v24  ;;  %v1136_v21 = vld [vmem:[#allocation2] sm:$0xff] }
 0x1ca   :  { %3021 = vrot.lane.b32.xlu0 %v3020_v54, %s3118_s14  ;;  %v956_v17 = vadd.f32 %v2334_v12, %v3815_v63 }
 0x1cb   :  { %3026 = vrot.lane.b32.xlu1 %v3025_v35, %s3117_s13  ;;  %1134 = vst.msk [vmem:[#allocation2 + $0x111] sm:$0xff] %vm21_vm0, %v1118_v13  ;;  %v4033_v22 = vld [vmem:[#allocation2 + $0x100] sm:$0xff] }
 0x1cc   :  { %v1101_v49 = vadd.f32 %v3736_v16, %v956_v17  ;;  %v3035_v44 = vpack.i.bf16 %v4006_v3, %v4033_v22  ;;  %v4038_v33 = vld [vmem:[#allocation2 + $0x101] sm:$0xff] }
 0x1cd   :  { %v4041_v19 = vld [vmem:[#allocation2 + $0x102] sm:$0xff]  ;;  %v3040_v28 = vpack.i.bf16 %v4017_v6, %v4038_v33 }
 0x1ce   :  { %3031 = vrot.lane.b32.xlu0 %v3030_v39, %s3116_s12  ;;  %v1119_v63 = vmax.f32 %v1101_v49, 0.0  ;;  %v3045_v16 = vpack.i.bf16 %v4019_v23, %v4041_v19 }
 0x1cf   :  { %3036 = vrot.lane.b32.xlu1 %v3035_v44, %s3118_s14 }
 0x1d0   :  { %1135 = vst.msk [vmem:[#allocation2 + $0x121] sm:$0xff] %vm21_vm0, %v1119_v63 }
 0x1d2   :  { %3041 = vrot.lane.b32.xlu0 %v3040_v28, %s3117_s13  ;;  %v4051_v20 = vld [vmem:[#allocation2 + $0x110] sm:$0xff] }
 0x1d3   :  { %3046 = vrot.lane.b32.xlu1 %v3045_v16, %s3116_s12  ;;  %v4053_v45 = vld [vmem:[#allocation2 + $0x111] sm:$0xff]  ;;  %v3050_v53 = vpack.i.bf16 %v4025_v24, %v4051_v20 }
 0x1d4   :  { %v3055_v55 = vpack.i.bf16 %v4033_v22, %v4053_v45  ;;  %v4059_v56 = vld [vmem:[#allocation2 + $0x112] sm:$0xff] }
 0x1d5   :  { %v3060_v18 = vpack.i.bf16 %v4038_v33, %v4059_v56  ;;  %v3080_v4 = vpack.i.bf16 %v4059_v56, %v1247_v34 }
 0x1d6   :  { %3051 = vrot.lane.b32.xlu0 %v3050_v53, %s3118_s14 }
 0x1d7   :  { %3056 = vrot.lane.b32.xlu1 %v3055_v55, %s3117_s13  ;;  %v1246_v59 = vld [vmem:[#allocation2 + $0x120] sm:$0xff] }
 0x1d8   :  { %v3065_v37 = vpack.i.bf16 %v4041_v19, %v1246_v59  ;;  %v4066_v40 = vld [vmem:[#allocation2 + $0x121] sm:$0xff]  ;;  %v3085_v5 = vpack.i.bf16 %v1246_v59, %v1263_v25 }
 0x1d9   :  { %v4069_v1 = vld [vmem:[#allocation2 + $0x122] sm:$0xff]  ;;  %v3070_v27 = vpack.i.bf16 %v4051_v20, %v4066_v40 }
 0x1da   :  { %3061 = vrot.lane.b32.xlu0 %v3060_v18, %s3116_s12  ;;  %v3075_v48 = vpack.i.bf16 %v4053_v45, %v4069_v1 }
 0x1db   :  { %3066 = vrot.lane.b32.xlu1 %v3065_v37, %s3118_s14 }
 0x1de   :  { %3071 = vrot.lane.b32.xlu0 %v3070_v27, %s3117_s13 }
 0x1df   :  { %3076 = vrot.lane.b32.xlu1 %v3075_v48, %s3116_s12 }
 0x1e2   :  { %3081 = vrot.lane.b32.xlu0 %v3080_v4, %s3118_s14 }
 0x1e3   :  { %3086 = vrot.lane.b32.xlu1 %v3085_v5, %s3117_s13 }
 0x1f4   :  { %v2852_v36 = vpop.permute.xlu0 %2851 }
 0x1f5   :  { %v2854_v0 = vunpack.i.h.bf16 %v2852_v36  ;;  %v2853_v26 = vunpack.i.l.bf16 %v2852_v36 }
 0x1f7   :  { %v1664_v39 = vsel %vm21_vm0, %v1136_v21, %v2854_v0  ;;  %v1712_v49 = vsel %vm21_vm0, %v3866_v11, %v2853_v26 }
 0x1f9   :  { %v2857_v8 = vpop.permute.xlu1 %2856 }
 0x1fa   :  { %v2862_v54 = vpop.permute.xlu0 %2861  ;;  %v2859_v35 = vunpack.i.h.bf16 %v2857_v8  ;;  %v2858_v12 = vunpack.i.l.bf16 %v2857_v8 }
 0x1fb   :  { %v2864_v13 = vunpack.i.h.bf16 %v2862_v54  ;;  %v2863_v17 = vunpack.i.l.bf16 %v2862_v54 }
 0x1fc   :  { %v1680_v44 = vsel %vm641_vm2, %v1664_v39, %v2859_v35  ;;  %v1728_v63 = vsel %vm641_vm2, %v1712_v49, %v2858_v12 }
 0x1fd   :  { %v2867_v28 = vpop.permute.xlu1 %2866  ;;  %v1744_v16 = vsel %vm658_vm3, %v1728_v63, %v2863_v17  ;;  %v1696_v53 = vsel %vm658_vm3, %v1680_v44, %v2864_v13 }
 0x1fe   :  { %v2869_v55 = vunpack.i.h.bf16 %v2867_v28  ;;  %v2868_v18 = vunpack.i.l.bf16 %v2867_v28  ;;  %1915 = vmatprep.mubr.f32.mxu1 %v1744_v16 }
 0x1ff   :  { %1916 = vmatmul.mubr.f32.vlgmr.msra.gmra.mrb[16].mxu1 %v1696_v53 }
 0x200   :  { %v2872_v59 = vpop.permute.xlu0 %2871  ;;  %2601 = vmatpush3.bf16.msra.mxu1 %v3694_v52  ;;  %v1713_v25 = vsel %vm21_vm0, %v3857_v7, %v2868_v18  ;;  %v1665_v4 = vsel %vm21_vm0, %v3852_v38, %v2869_v55 }
 0x201   :  { %v2874_v37 = vunpack.i.h.bf16 %v2872_v59  ;;  %v2873_v27 = vunpack.i.l.bf16 %v2872_v59  ;;  %v2877_v48 = vpop.permute.xlu1 %2876  ;;  %2600 = vmatprep.subr.bf16.mxu1 %v3704_v58 }
 0x202   :  { %v2879_v11 = vunpack.i.h.bf16 %v2877_v48  ;;  %v2878_v34 = vunpack.i.l.bf16 %v2877_v48 }
 0x203   :  { %v1729_v5 = vsel %vm641_vm2, %v1713_v25, %v2873_v27  ;;  %v1681_v36 = vsel %vm641_vm2, %v1665_v4, %v2874_v37 }
 0x204   :  { %v2882_v0 = vpop.permute.xlu0 %2881  ;;  %v1745_v52 = vsel %vm658_vm3, %v1729_v5, %v2878_v34  ;;  %v1697_v26 = vsel %vm658_vm3, %v1681_v36, %v2879_v11  ;;  %2602 = vmatpush3.bf16.msra.mxu1 %v3704_v58 }
 0x205   :  { %v2884_v21 = vunpack.i.h.bf16 %v2882_v0  ;;  %v2883_v8 = vunpack.i.l.bf16 %v2882_v0  ;;  %v2887_v54 = vpop.permute.xlu1 %2886  ;;  %1920 = vmatprep.mubr.f32.mxu1 %v1745_v52 }
 0x206   :  { %v2889_v35 = vunpack.i.h.bf16 %v2887_v54  ;;  %v2888_v7 = vunpack.i.l.bf16 %v2887_v54  ;;  %1921 = vmatmul.mubr.f32.gmra.mrb[18].mxu1 %v1697_v26 }
 0x207   :  { %v1714_v38 = vsel %vm21_vm0, %v3874_v42, %v2883_v8  ;;  %v1666_v12 = vsel %vm21_vm0, %v3855_v47, %v2884_v21 }
 0x208   :  { %v2892_v13 = vpop.permute.xlu0 %2891  ;;  %v1730_v58 = vsel %vm641_vm2, %v1714_v38, %v2888_v7  ;;  %v1682_v28 = vsel %vm641_vm2, %v1666_v12, %v2889_v35 }
 0x209   :  { %v2894_v17 = vunpack.i.h.bf16 %v2892_v13  ;;  %v2893_v39 = vunpack.i.l.bf16 %v2892_v13  ;;  %v2897_v49 = vpop.permute.xlu1 %2896 }
 0x20a   :  { %v2899_v44 = vunpack.i.h.bf16 %v2897_v49  ;;  %v2898_v63 = vunpack.i.l.bf16 %v2897_v49 }
 0x20b   :  { %v1746_v16 = vsel %vm658_vm3, %v1730_v58, %v2893_v39  ;;  %v1698_v53 = vsel %vm658_vm3, %v1682_v28, %v2894_v17 }
 0x20c   :  { %v2902_v55 = vpop.permute.xlu0 %2901  ;;  %1925 = vmatprep.mubr.f32.mxu1 %v1746_v16  ;;  %v1715_v27 = vsel %vm21_vm0, %v3891_v50, %v2898_v63  ;;  %v1667_v48 = vsel %vm21_vm0, %v3872_v29, %v2899_v44 }
 0x20d   :  { %v2904_v42 = vunpack.i.h.bf16 %v2902_v55  ;;  %v2903_v18 = vunpack.i.l.bf16 %v2902_v55  ;;  %v2907_v59 = vpop.permute.xlu1 %2906  ;;  %1926 = vmatmul.mubr.f32.gmra.mrb[20].mxu1 %v1698_v53 }
 0x20e   :  { %v2909_v47 = vunpack.i.h.bf16 %v2907_v59  ;;  %v2908_v37 = vunpack.i.l.bf16 %v2907_v59 }
 0x20f   :  { %v1731_v11 = vsel %vm641_vm2, %v1715_v27, %v2903_v18  ;;  %v1683_v34 = vsel %vm641_vm2, %v1667_v48, %v2904_v42 }
 0x210   :  { %v2912_v25 = vpop.permute.xlu0 %2911  ;;  %v1747_v4 = vsel %vm658_vm3, %v1731_v11, %v2908_v37  ;;  %v1699_v5 = vsel %vm658_vm3, %v1683_v34, %v2909_v47 }
 0x211   :  { %v2914_v36 = vunpack.i.h.bf16 %v2912_v25  ;;  %v2913_v0 = vunpack.i.l.bf16 %v2912_v25  ;;  %v2917_v52 = vpop.permute.xlu1 %2916  ;;  %1930 = vmatprep.mubr.f32.mxu1 %v1747_v4 }
 0x212   :  { %v2919_v26 = vunpack.i.h.bf16 %v2917_v52  ;;  %v2918_v21 = vunpack.i.l.bf16 %v2917_v52  ;;  %1931 = vmatmul.mubr.f32.gmra.mrb[22].mxu1 %v1699_v5 }
 0x213   :  { %v1716_v50 = vsel %vm21_vm0, %v3904_v14, %v2913_v0  ;;  %v1668_v29 = vsel %vm21_vm0, %v3886_v10, %v2914_v36 }
 0x214   :  { %v2922_v8 = vpop.permute.xlu0 %2921  ;;  %v1732_v13 = vsel %vm641_vm2, %v1716_v50, %v2918_v21  ;;  %v1684_v17 = vsel %vm641_vm2, %v1668_v29, %v2919_v26 }
 0x215   :  { %v2924_v54 = vunpack.i.h.bf16 %v2922_v8  ;;  %v2923_v35 = vunpack.i.l.bf16 %v2922_v8  ;;  %v2927_v7 = vpop.permute.xlu1 %2926 }
 0x216   :  { %v2929_v38 = vunpack.i.h.bf16 %v2927_v7  ;;  %v2928_v12 = vunpack.i.l.bf16 %v2927_v7 }
 0x217   :  { %v1748_v39 = vsel %vm658_vm3, %v1732_v13, %v2923_v35  ;;  %v1700_v49 = vsel %vm658_vm3, %v1684_v17, %v2924_v54  ;;  %v1144_v17 = vld [vmem:[#allocation2 + $0xa0] sm:$0xff] }
 0x218   :  { %v2932_v44 = vpop.permute.xlu0 %2931  ;;  %1935 = vmatprep.mubr.f32.mxu1 %v1748_v39  ;;  %v1717_v16 = vsel %vm21_vm0, %v3921_v62, %v2928_v12  ;;  %v1669_v53 = vsel %vm21_vm0, %v3902_v15, %v2929_v38 }
 0x219   :  { %v2934_v14 = vunpack.i.h.bf16 %v2932_v44  ;;  %v2933_v63 = vunpack.i.l.bf16 %v2932_v44  ;;  %v2937_v58 = vpop.permute.xlu1 %2936  ;;  %1936 = vmatmul.mubr.f32.gmra.mrb[24].mxu1 %v1700_v49 }
 0x21a   :  { %v2939_v10 = vunpack.i.h.bf16 %v2937_v58  ;;  %v2938_v28 = vunpack.i.l.bf16 %v2937_v58 }
 0x21b   :  { %v1733_v55 = vsel %vm641_vm2, %v1717_v16, %v2933_v63  ;;  %v1685_v42 = vsel %vm641_vm2, %v1669_v53, %v2934_v14 }
 0x21c   :  { %v2942_v18 = vpop.permute.xlu0 %2941  ;;  %v1749_v59 = vsel %vm658_vm3, %v1733_v55, %v2938_v28  ;;  %v1701_v47 = vsel %vm658_vm3, %v1685_v42, %v2939_v10 }
 0x21d   :  { %v2952_v37 = vpop.permute.xlu1 %2951  ;;  %1940 = vmatprep.mubr.f32.mxu1 %v1749_v59  ;;  %v2944_v27 = vunpack.i.h.bf16 %v2942_v18  ;;  %v2943_v48 = vunpack.i.l.bf16 %v2942_v18 }
 0x21e   :  { %1941 = vmatmul.mubr.f32.gmra.mrb[26].mxu1 %v1701_v47  ;;  %v2954_v62 = vunpack.i.h.bf16 %v2952_v37  ;;  %v2953_v25 = vunpack.i.l.bf16 %v2952_v37 }
 0x21f   :  { %v1718_v15 = vsel %vm21_vm0, %v3934_v61, %v2943_v48  ;;  %v1670_v5 = vsel %vm21_vm0, %v3916_v46, %v2944_v27 }
 0x220   :  { %v2947_v11 = vpop.permute.xlu0 %2946  ;;  %v1734_v54 = vsel %vm641_vm2, %v1718_v15, %v2953_v25  ;;  %v1686_v35 = vsel %vm641_vm2, %v1670_v5, %v2954_v62 }
 0x221   :  { %v2962_v34 = vpop.permute.xlu1 %2961  ;;  %v2948_v26 = vunpack.i.l.bf16 %v2947_v11  ;;  %v2949_v39 = vunpack.i.h.bf16 %v2947_v11 }
 0x222   :  { %v2963_v4 = vunpack.i.l.bf16 %v2962_v34  ;;  %v2964_v36 = vunpack.i.h.bf16 %v2962_v34 }
 0x224   :  { %v2957_v0 = vpop.permute.xlu0 %2956  ;;  %v1719_v52 = vsel %vm21_vm0, %v3953_v2, %v2963_v4  ;;  %v1671_v13 = vsel %vm21_vm0, %v3932_v30, %v2964_v36 }
 0x225   :  { %v2959_v21 = vunpack.i.h.bf16 %v2957_v0  ;;  %v2958_v50 = vunpack.i.l.bf16 %v2957_v0  ;;  %v2967_v29 = vpop.permute.xlu1 %2966  ;;  %v1735_v46 = vsel %vm641_vm2, %v1719_v52, %v2948_v26  ;;  %v1687_v10 = vsel %vm641_vm2, %v1671_v13, %v2949_v39 }
 0x226   :  { %v2968_v8 = vunpack.i.l.bf16 %v2967_v29  ;;  %v2969_v38 = vunpack.i.h.bf16 %v2967_v29 }
 0x227   :  { %v1750_v7 = vsel %vm658_vm3, %v1734_v54, %v2958_v50  ;;  %v1702_v61 = vsel %vm658_vm3, %v1686_v35, %v2959_v21 }
 0x228   :  { %v2972_v12 = vpop.permute.xlu0 %2971  ;;  %1945 = vmatprep.mubr.f32.mxu1 %v1750_v7  ;;  %v1751_v2 = vsel %vm658_vm3, %v1735_v46, %v2968_v8  ;;  %v1703_v55 = vsel %vm658_vm3, %v1687_v10, %v2969_v38 }
 0x229   :  { %v2974_v49 = vunpack.i.h.bf16 %v2972_v12  ;;  %v2973_v44 = vunpack.i.l.bf16 %v2972_v12  ;;  %v2977_v14 = vpop.permute.xlu1 %2976  ;;  %1946 = vmatmul.mubr.f32.gmra.mrb[28].mxu1 %v1702_v61 }
 0x22a   :  { %v2979_v63 = vunpack.i.h.bf16 %v2977_v14  ;;  %v2978_v58 = vunpack.i.l.bf16 %v2977_v14  ;;  %1950 = vmatprep.mubr.f32.mxu1 %v1751_v2 }
 0x22b   :  { %v1720_v28 = vsel %vm21_vm0, %v3978_v32, %v2973_v44  ;;  %v1672_v16 = vsel %vm21_vm0, %v1144_v17, %v2974_v49 }
 0x22c   :  { %v2982_v53 = vpop.permute.xlu0 %2981  ;;  %v1736_v37 = vsel %vm641_vm2, %v1720_v28, %v2978_v58  ;;  %v1688_v27 = vsel %vm641_vm2, %v1672_v16, %v2979_v63 }
 0x22d   :  { %v2984_v30 = vunpack.i.h.bf16 %v2982_v53  ;;  %v2983_v42 = vunpack.i.l.bf16 %v2982_v53  ;;  %v2987_v18 = vpop.permute.xlu1 %2986  ;;  %1951 = vmatmul.mubr.f32.gmra.mrb[30].mxu1 %v1703_v55 }
 0x22e   :  { %v2989_v59 = vunpack.i.h.bf16 %v2987_v18  ;;  %v2988_v47 = vunpack.i.l.bf16 %v2987_v18 }
 0x22f   :  { %v1752_v48 = vsel %vm658_vm3, %v1736_v37, %v2983_v42  ;;  %v1704_v11 = vsel %vm658_vm3, %v1688_v27, %v2984_v30 }
 0x230   :  { %v2992_v32 = vpop.permute.xlu0 %2991  ;;  %1955 = vmatprep.mubr.f32.mxu1 %v1752_v48  ;;  %v1721_v5 = vsel %vm21_vm0, %v3970_v43, %v2988_v47  ;;  %v1673_v36 = vsel %vm21_vm0, %v3974_v41, %v2989_v59 }
 0x231   :  { %v2994_v34 = vunpack.i.h.bf16 %v2992_v32  ;;  %v2993_v62 = vunpack.i.l.bf16 %v2992_v32  ;;  %v2997_v25 = vpop.permute.xlu1 %2996  ;;  %1956 = vmatmul.mubr.f32.gmra.mrb[32].mxu1 %v1704_v11 }
 0x232   :  { %v2999_v4 = vunpack.i.h.bf16 %v2997_v25  ;;  %v2998_v15 = vunpack.i.l.bf16 %v2997_v25 }
 0x233   :  { %v1737_v0 = vsel %vm641_vm2, %v1721_v5, %v2993_v62  ;;  %v1689_v52 = vsel %vm641_vm2, %v1673_v36, %v2994_v34 }
 0x234   :  { %v3002_v26 = vpop.permute.xlu0 %3001  ;;  %v1753_v21 = vsel %vm658_vm3, %v1737_v0, %v2998_v15  ;;  %v1705_v50 = vsel %vm658_vm3, %v1689_v52, %v2999_v4 }
 0x235   :  { %v3004_v29 = vunpack.i.h.bf16 %v3002_v26  ;;  %v3003_v8 = vunpack.i.l.bf16 %v3002_v26  ;;  %v3007_v54 = vpop.permute.xlu1 %3006  ;;  %1960 = vmatprep.mubr.f32.mxu1 %v1753_v21 }
 0x236   :  { %v3009_v35 = vunpack.i.h.bf16 %v3007_v54  ;;  %v3008_v7 = vunpack.i.l.bf16 %v3007_v54  ;;  %1961 = vmatmul.mubr.f32.gmra.mrb[34].mxu1 %v1705_v50 }
 0x237   :  { %v1722_v43 = vsel %vm21_vm0, %v3987_v51, %v3003_v8  ;;  %v1674_v41 = vsel %vm21_vm0, %v3965_v9, %v3004_v29 }
 0x238   :  { %v3012_v61 = vpop.permute.xlu0 %3011  ;;  %v1738_v17 = vsel %vm641_vm2, %v1722_v43, %v3008_v7  ;;  %v1690_v39 = vsel %vm641_vm2, %v1674_v41, %v3009_v35 }
 0x239   :  { %v3014_v46 = vunpack.i.h.bf16 %v3012_v61  ;;  %v3013_v38 = vunpack.i.l.bf16 %v3012_v61  ;;  %v3017_v12 = vpop.permute.xlu1 %3016 }
 0x23a   :  { %v3019_v2 = vunpack.i.h.bf16 %v3017_v12  ;;  %v3018_v13 = vunpack.i.l.bf16 %v3017_v12 }
 0x23b   :  { %v1754_v49 = vsel %vm658_vm3, %v1738_v17, %v3013_v38  ;;  %v1706_v44 = vsel %vm658_vm3, %v1690_v39, %v3014_v46 }
 0x23c   :  { %v3022_v14 = vpop.permute.xlu0 %3021  ;;  %1965 = vmatprep.mubr.f32.mxu1 %v1754_v49  ;;  %v1723_v28 = vsel %vm21_vm0, %v4003_v57, %v3018_v13  ;;  %v1675_v16 = vsel %vm21_vm0, %v3985_v31, %v3019_v2 }
 0x23d   :  { %v3024_v51 = vunpack.i.h.bf16 %v3022_v14  ;;  %v3023_v63 = vunpack.i.l.bf16 %v3022_v14  ;;  %v3027_v58 = vpop.permute.xlu1 %3026  ;;  %1966 = vmatmul.mubr.f32.gmra.mrb[36].mxu1 %v1706_v44 }
 0x23e   :  { %v3029_v9 = vunpack.i.h.bf16 %v3027_v58  ;;  %v3028_v10 = vunpack.i.l.bf16 %v3027_v58 }
 0x23f   :  { %v1739_v53 = vsel %vm641_vm2, %v1723_v28, %v3023_v63  ;;  %v1691_v55 = vsel %vm641_vm2, %v1675_v16, %v3024_v51 }
 0x240   :  { %v3032_v30 = vpop.permute.xlu0 %3031  ;;  %v1755_v42 = vsel %vm658_vm3, %v1739_v53, %v3028_v10  ;;  %v1707_v18 = vsel %vm658_vm3, %v1691_v55, %v3029_v9 }
 0x241   :  { %v3034_v59 = vunpack.i.h.bf16 %v3032_v30  ;;  %v3033_v47 = vunpack.i.l.bf16 %v3032_v30  ;;  %v3037_v37 = vpop.permute.xlu1 %3036  ;;  %1970 = vmatprep.mubr.f32.mxu1 %v1755_v42 }
 0x242   :  { %v3039_v27 = vunpack.i.h.bf16 %v3037_v37  ;;  %v3038_v48 = vunpack.i.l.bf16 %v3037_v37  ;;  %1971 = vmatmul.mubr.f32.gmra.mrb[38].mxu1 %v1707_v18  ;;  %v1279_v37 = vld [vmem:[#allocation2 + $0x132] sm:$0xff] }
 0x243   :  { %v1724_v57 = vsel %vm21_vm0, %v4019_v23, %v3033_v47  ;;  %v1676_v31 = vsel %vm21_vm0, %v3999_v60, %v3034_v59 }
 0x244   :  { %v3042_v11 = vpop.permute.xlu0 %3041  ;;  %v1740_v15 = vsel %vm641_vm2, %v1724_v57, %v3038_v48  ;;  %v1692_v5 = vsel %vm641_vm2, %v1676_v31, %v3039_v27 }
 0x245   :  { %v3044_v32 = vunpack.i.h.bf16 %v3042_v11  ;;  %v3043_v34 = vunpack.i.l.bf16 %v3042_v11  ;;  %v3047_v62 = vpop.permute.xlu1 %3046 }
 0x246   :  { %v3049_v25 = vunpack.i.h.bf16 %v3047_v62  ;;  %v3048_v4 = vunpack.i.l.bf16 %v3047_v62 }
 0x247   :  { %v1756_v36 = vsel %vm658_vm3, %v1740_v15, %v3043_v34  ;;  %v1708_v0 = vsel %vm658_vm3, %v1692_v5, %v3044_v32 }
 0x248   :  { %v3052_v52 = vpop.permute.xlu0 %3051  ;;  %1975 = vmatprep.mubr.f32.mxu1 %v1756_v36  ;;  %v1725_v29 = vsel %vm21_vm0, %v4038_v33, %v3048_v4  ;;  %v1677_v8 = vsel %vm21_vm0, %v4017_v6, %v3049_v25  ;;  %v2141_v25 = vld [vmem:[%s4330_s0] sm:$0xff] }
 0x249   :  { %v3054_v23 = vunpack.i.h.bf16 %v3052_v52  ;;  %v3053_v26 = vunpack.i.l.bf16 %v3052_v52  ;;  %v3057_v21 = vpop.permute.xlu1 %3056  ;;  %1976 = vmatmul.mubr.f32.gmra.mrb[40].mxu1 %v1708_v0 }
 0x24a   :  { %v3059_v60 = vunpack.i.h.bf16 %v3057_v21  ;;  %v3058_v50 = vunpack.i.l.bf16 %v3057_v21 }
 0x24b   :  { %v1741_v54 = vsel %vm641_vm2, %v1725_v29, %v3053_v26  ;;  %v1693_v35 = vsel %vm641_vm2, %v1677_v8, %v3054_v23  ;;  %v2142_v26 = vld [vmem:[%s4330_s0 + $0x8] sm:$0xff] }
 0x24c   :  { %v3062_v7 = vpop.permute.xlu0 %3061  ;;  %v1757_v43 = vsel %vm658_vm3, %v1741_v54, %v3058_v50  ;;  %v1709_v41 = vsel %vm658_vm3, %v1693_v35, %v3059_v60 }
 0x24d   :  { %v3064_v61 = vunpack.i.h.bf16 %v3062_v7  ;;  %v3063_v46 = vunpack.i.l.bf16 %v3062_v7  ;;  %v3067_v38 = vpop.permute.xlu1 %3066  ;;  %1980 = vmatprep.mubr.f32.mxu1 %v1757_v43  ;;  %v2143_v7 = vld [vmem:[%s4330_s0 + $0x10] sm:$0xff] }
 0x24e   :  { %v3069_v12 = vunpack.i.h.bf16 %v3067_v38  ;;  %v3068_v2 = vunpack.i.l.bf16 %v3067_v38  ;;  %1981 = vmatmul.mubr.f32.gmra.mrb[42].mxu1 %v1709_v41 }
 0x24f   :  { %v1726_v33 = vsel %vm21_vm0, %v4053_v45, %v3063_v46  ;;  %v1678_v6 = vsel %vm21_vm0, %v4033_v22, %v3064_v61 }
 0x250   :  { %v3072_v13 = vpop.permute.xlu0 %3071  ;;  %v1742_v51 = vsel %vm641_vm2, %v1726_v33, %v3068_v2  ;;  %v1694_v63 = vsel %vm641_vm2, %v1678_v6, %v3069_v12  ;;  %v2144_v33 = vld [vmem:[%s4330_s0 + $0x18] sm:$0xff] }
 0x251   :  { %v3074_v17 = vunpack.i.h.bf16 %v3072_v13  ;;  %v3073_v39 = vunpack.i.l.bf16 %v3072_v13  ;;  %v3077_v49 = vpop.permute.xlu1 %3076 }
 0x252   :  { %v3079_v44 = vunpack.i.h.bf16 %v3077_v49  ;;  %v3078_v14 = vunpack.i.l.bf16 %v3077_v49 }
 0x253   :  { %v1758_v58 = vsel %vm658_vm3, %v1742_v51, %v3073_v39  ;;  %v1710_v9 = vsel %vm658_vm3, %v1694_v63, %v3074_v17  ;;  %v2145_v51 = vld [vmem:[%s4330_s0 + $0x20] sm:$0xff] }
 0x254   :  { %v3082_v10 = vpop.permute.xlu0 %3081  ;;  %1985 = vmatprep.mubr.f32.mxu1 %v1758_v58  ;;  %v1727_v55 = vsel %vm21_vm0, %v4066_v40, %v3078_v14  ;;  %v1679_v30 = vsel %vm21_vm0, %v4051_v20, %v3079_v44 }
 0x255   :  { %v3084_v45 = vunpack.i.h.bf16 %v3082_v10  ;;  %v3083_v28 = vunpack.i.l.bf16 %v3082_v10  ;;  %v3087_v16 = vpop.permute.xlu1 %3086  ;;  %1986 = vmatmul.mubr.f32.gmra.mrb[44].mxu1 %v1710_v9 }
 0x256   :  { %v3089_v22 = vunpack.i.h.bf16 %v3087_v16  ;;  %v3088_v53 = vunpack.i.l.bf16 %v3087_v16 }
 0x257   :  { %v1743_v42 = vsel %vm641_vm2, %v1727_v55, %v3083_v28  ;;  %v1695_v18 = vsel %vm641_vm2, %v1679_v30, %v3084_v45 }
 0x258   :  { %v1759_v59 = vsel %vm658_vm3, %v1743_v42, %v3088_v53  ;;  %v1711_v47 = vsel %vm658_vm3, %v1695_v18, %v3089_v22  ;;  %v2146_v22 = vld [vmem:[%s4330_s0 + $0x28] sm:$0xff] }
 0x259   :  { %1990 = vmatprep.mubr.f32.mxu1 %v1759_v59 }
 0x25a   :  { %1991 = vmatmul.mubr.f32.gmra.mrb[46].mxu1 %v1711_v47 }
 0x25b   :  { %2510 = vmatprep.mubr.msk.f32.mxu1 %vm21_vm0, %v4006_v3 }
 0x25e   :  { %2511 = vmatmul.mubr.msk.f32.vlgmr.msra.gmra.mrb[48].mxu1 %vm21_vm0, %v4025_v24  ;;  %v2497_v40 = vpop.f32.mrb[32].mxu0 }
 0x25f   :  { %2513 = vmatprep.mubr.msk.f32.mxu1 %vm21_vm0, %v4041_v19  ;;  %v2062_v20 = vpop.f32.mrb[33].mxu0 }
 0x262   :  { %2514 = vmatmul.mubr.msk.f32.gmra.mrb[50].mxu1 %vm21_vm0, %v4059_v56  ;;  %v4232_v56 = vld [vmem:[%s4334_s4] ss:$0 sm:$0xff] }
 0x263   :  { %2516 = vmatprep.mubr.msk.f32.mxu1 %vm21_vm0, %v4069_v1 }
 0x266   :  { %2517 = vmatmul.mubr.msk.f32.gmra.mrb[52].mxu1 %vm21_vm0, %v1279_v37 }
 0x26a   :  { %v2500_v27 = vpop.f32.mrb[34].mxu0 }
 0x26b   :  { %v2072_v48 = vpop.f32.mrb[35].mxu0 }
 0x276   :  { %v2503_v3 = vpop.f32.mrb[36].mxu0 }
 0x277   :  { %v2082_v57 = vpop.f32.mrb[37].mxu0 }
 0x27c   :  { %v4221_v31 = vpop.f32.mrb[38].mxu0 }
 0x27d   :  { %v4223_v24 = vpop.f32.mrb[39].mxu0 }
 0x28e   :  { %v4225_v11 = vpop.f32.mrb[40].mxu0 }
 0x28f   :  { %v4227_v19 = vpop.f32.mrb[41].mxu0 }
 0x2d2   :  { %v2387_v32 = vpop.f32.mrb[16].mxu1 }
 0x2d3   :  { %v2388_v1 = vpop.f32.mrb[17].mxu1 }
 0x2d4   :  { %v2389_v34 = vadd.f32 %v2388_v1, %v2387_v32  ;;  %v2148_v1 = vld [vmem:[%s4330_s0 + $0x38] sm:$0xff] }
 0x2d6   :  { %v1918_v62 = vadd.f32 %v2389_v34, %v4232_v56 }
 0x2d8   :  { %v2063_v4 = vadd.f32 %v2062_v20, %v1918_v62  ;;  %v2147_v20 = vld [vmem:[%s4330_s0 + $0x30] sm:$0xff] }
 0x2d9   :  { %v2390_v15 = vpop.f32.mrb[18].mxu1 }
 0x2da   :  { %v2157_v5 = vadd.f32 %v2141_v25, %v2063_v4  ;;  %v2391_v36 = vpop.f32.mrb[19].mxu1 }
 0x2db   :  { %v2392_v0 = vadd.f32 %v2391_v36, %v2390_v15 }
 0x2dc   :  { %v2173_v52 = vmax.f32 %v2157_v5, 0.0 }
 0x2dd   :  { %v1923_v23 = vadd.f32 %v2392_v0, %v4232_v56 }
 0x2de   :  { %2189 = vst.msk [vmem:[#allocation3] sm:$0xff] %vm21_vm0, %v2173_v52 }
 0x2df   :  { %v2068_v21 = vadd.f32 %v2497_v40, %v1923_v23 }
 0x2e0   :  { %v2393_v60 = vpop.f32.mrb[20].mxu1 }
 0x2e1   :  { %v2158_v50 = vadd.f32 %v2142_v26, %v2068_v21  ;;  %v2394_v29 = vpop.f32.mrb[21].mxu1 }
 0x2e2   :  { %v2395_v8 = vadd.f32 %v2394_v29, %v2393_v60 }
 0x2e3   :  { %v2174_v54 = vmax.f32 %v2158_v50, 0.0  ;;  %v2150_v50 = vld [vmem:[%s4330_s0 + $0x48] sm:$0xff] }
 0x2e4   :  { %v1928_v35 = vadd.f32 %v2395_v8, %v4232_v56 }
 0x2e5   :  { %2190 = vst.msk [vmem:[#allocation3 + $0x8] sm:$0xff] %vm21_vm0, %v2174_v54  ;;  %v2396_v43 = vpop.f32.mrb[22].mxu1 }
 0x2e6   :  { %v2073_v41 = vadd.f32 %v2072_v48, %v1928_v35  ;;  %v2397_v61 = vpop.f32.mrb[23].mxu1 }
 0x2e7   :  { %v2398_v46 = vadd.f32 %v2397_v61, %v2396_v43 }
 0x2e8   :  { %v2159_v38 = vadd.f32 %v2143_v7, %v2073_v41 }
 0x2e9   :  { %v1933_v12 = vadd.f32 %v2398_v46, %v4232_v56 }
 0x2ea   :  { %v2175_v2 = vmax.f32 %v2159_v38, 0.0 }
 0x2eb   :  { %v2078_v6 = vadd.f32 %v2500_v27, %v1933_v12 }
 0x2ec   :  { %2191 = vst.msk [vmem:[#allocation3 + $0x10] sm:$0xff] %vm21_vm0, %v2175_v2  ;;  %v2399_v13 = vpop.f32.mrb[24].mxu1 }
 0x2ed   :  { %v2160_v17 = vadd.f32 %v2144_v33, %v2078_v6  ;;  %v2400_v39 = vpop.f32.mrb[25].mxu1 }
 0x2ee   :  { %v2401_v49 = vadd.f32 %v2400_v39, %v2399_v13 }
 0x2ef   :  { %v2176_v44 = vmax.f32 %v2160_v17, 0.0 }
 0x2f0   :  { %v1938_v14 = vadd.f32 %v2401_v49, %v4232_v56 }
 0x2f1   :  { %2192 = vst.msk [vmem:[#allocation3 + $0x18] sm:$0xff] %vm21_vm0, %v2176_v44  ;;  %v2402_v63 = vpop.f32.mrb[26].mxu1 }
 0x2f2   :  { %v2083_v58 = vadd.f32 %v2082_v57, %v1938_v14  ;;  %v2403_v9 = vpop.f32.mrb[27].mxu1 }
 0x2f3   :  { %v2404_v10 = vadd.f32 %v2403_v9, %v2402_v63  ;;  %v2152_v63 = vld [vmem:[%s4330_s0 + $0x58] sm:$0xff] }
 0x2f4   :  { %v2161_v45 = vadd.f32 %v2145_v51, %v2083_v58 }
 0x2f5   :  { %v1943_v28 = vadd.f32 %v2404_v10, %v4232_v56 }
 0x2f6   :  { %v2177_v16 = vmax.f32 %v2161_v45, 0.0  ;;  %v2151_v45 = vld [vmem:[%s4330_s0 + $0x50] sm:$0xff] }
 0x2f7   :  { %v2088_v53 = vadd.f32 %v2503_v3, %v1943_v28 }
 0x2f8   :  { %2193 = vst.msk [vmem:[#allocation3 + $0x20] sm:$0xff] %vm21_vm0, %v2177_v16 }
 0x2f9   :  { %v2162_v55 = vadd.f32 %v2146_v22, %v2088_v53 }
 0x2fb   :  { %v2178_v30 = vmax.f32 %v2162_v55, 0.0 }
 0x2fc   :  { %v2405_v42 = vpop.f32.mrb[28].mxu1 }
 0x2fd   :  { %2194 = vst.msk [vmem:[#allocation3 + $0x28] sm:$0xff] %vm21_vm0, %v2178_v30  ;;  %v2406_v18 = vpop.f32.mrb[29].mxu1  ;;  %v2154_v30 = vld [vmem:[%s4330_s0 + $0x68] sm:$0xff] }
 0x2fe   :  { %v2407_v59 = vadd.f32 %v2406_v18, %v2405_v42 }
 0x300   :  { %v1948_v47 = vadd.f32 %v2407_v59, %v4232_v56  ;;  %v2408_v40 = vpop.f32.mrb[30].mxu1 }
 0x301   :  { %v2409_v37 = vpop.f32.mrb[31].mxu1 }
 0x302   :  { %v2093_v27 = vadd.f32 %v4223_v24, %v1948_v47  ;;  %v2410_v48 = vadd.f32 %v2409_v37, %v2408_v40  ;;  %v2149_v24 = vld [vmem:[%s4330_s0 + $0x40] sm:$0xff] }
 0x303   :  { %v2153_v40 = vld [vmem:[%s4330_s0 + $0x60] sm:$0xff] }
 0x304   :  { %v2163_v3 = vadd.f32 %v2147_v20, %v2093_v27  ;;  %v1953_v57 = vadd.f32 %v2410_v48, %v4232_v56  ;;  %v2411_v32 = vpop.f32.mrb[32].mxu1 }
 0x305   :  { %v2412_v34 = vpop.f32.mrb[33].mxu1 }
 0x306   :  { %v2179_v62 = vmax.f32 %v2163_v3, 0.0  ;;  %v2098_v25 = vadd.f32 %v4221_v31, %v1953_v57  ;;  %v2413_v4 = vadd.f32 %v2412_v34, %v2411_v32  ;;  %v2156_v32 = vld [vmem:[%s4330_s0 + $0x78] sm:$0xff] }
 0x308   :  { %2195 = vst.msk [vmem:[#allocation3 + $0x30] sm:$0xff] %vm21_vm0, %v2179_v62  ;;  %v2164_v15 = vadd.f32 %v2148_v1, %v2098_v25  ;;  %v1958_v5 = vadd.f32 %v2413_v4, %v4232_v56  ;;  %v2155_v4 = vld [vmem:[%s4330_s0 + $0x70] sm:$0xff] }
 0x309   :  { %v2414_v36 = vpop.f32.mrb[34].mxu1 }
 0x30a   :  { %v2180_v0 = vmax.f32 %v2164_v15, 0.0  ;;  %v2103_v52 = vadd.f32 %v4227_v19, %v1958_v5  ;;  %v2415_v23 = vpop.f32.mrb[35].mxu1 }
 0x30b   :  { %v2416_v26 = vadd.f32 %v2415_v23, %v2414_v36 }
 0x30c   :  { %2196 = vst.msk [vmem:[#allocation3 + $0x38] sm:$0xff] %vm21_vm0, %v2180_v0  ;;  %v2165_v21 = vadd.f32 %v2149_v24, %v2103_v52 }
 0x30d   :  { %v1963_v31 = vadd.f32 %v2416_v26, %v4232_v56 }
 0x30e   :  { %v2181_v60 = vmax.f32 %v2165_v21, 0.0 }
 0x30f   :  { %v2108_v29 = vadd.f32 %v4225_v11, %v1963_v31 }
 0x310   :  { %2197 = vst.msk [vmem:[#allocation3 + $0x40] sm:$0xff] %vm21_vm0, %v2181_v60  ;;  %v2417_v8 = vpop.f32.mrb[36].mxu1 }
 0x311   :  { %v2166_v54 = vadd.f32 %v2150_v50, %v2108_v29  ;;  %v2418_v35 = vpop.f32.mrb[37].mxu1 }
 0x312   :  { %v2419_v19 = vadd.f32 %v2418_v35, %v2417_v8 }
 0x313   :  { %v2182_v7 = vmax.f32 %v2166_v54, 0.0 }
 0x314   :  { %v1968_v58 = vadd.f32 %v2419_v19, %v4232_v56 }
 0x315   :  { %2198 = vst.msk [vmem:[#allocation3 + $0x48] sm:$0xff] %vm21_vm0, %v2182_v7  ;;  %v2420_v43 = vpop.f32.mrb[38].mxu1 }
 0x316   :  { %v2421_v41 = vpop.f32.mrb[39].mxu1 }
 0x317   :  { %v2422_v61 = vadd.f32 %v2421_v41, %v2420_v43 }
 0x319   :  { %v1973_v14 = vadd.f32 %v2422_v61, %v4232_v56 }
 0x31c   :  { %v2423_v46 = vpop.f32.mrb[40].mxu1 }
 0x31d   :  { %v2424_v38 = vpop.f32.mrb[41].mxu1 }
 0x31e   :  { %v2425_v12 = vadd.f32 %v2424_v38, %v2423_v46 }
 0x320   :  { %v1978_v42 = vadd.f32 %v2425_v12, %v4232_v56 }
 0x321   :  { %v2426_v2 = vpop.f32.mrb[42].mxu1 }
 0x322   :  { %v2427_v33 = vpop.f32.mrb[43].mxu1 }
 0x323   :  { %v2428_v6 = vadd.f32 %v2427_v33, %v2426_v2 }
 0x325   :  { %v1983_v22 = vadd.f32 %v2428_v6, %v4232_v56 }
 0x328   :  { %v2429_v13 = vpop.f32.mrb[44].mxu1 }
 0x329   :  { %v2430_v11 = vpop.f32.mrb[45].mxu1 }
 0x32a   :  { %v2431_v17 = vadd.f32 %v2430_v11, %v2429_v13 }
 0x32c   :  { %v1988_v1 = vadd.f32 %v2431_v17, %v4232_v56 }
 0x32d   :  { %v2432_v39 = vpop.f32.mrb[46].mxu1 }
 0x32e   :  { %v2433_v49 = vpop.f32.mrb[47].mxu1 }
 0x32f   :  { %v2434_v44 = vadd.f32 %v2433_v49, %v2432_v39 }
 0x331   :  { %v2512_v51 = vpop.f32.mrb[48].mxu1  ;;  %v1993_v48 = vadd.f32 %v2434_v44, %v4232_v56 }
 0x332   :  { %v2118_v9 = vadd.f32 %v2512_v51, %v1973_v14  ;;  %v2112_v10 = vpop.f32.mrb[49].mxu1 }
 0x333   :  { %v2113_v28 = vadd.f32 %v2112_v10, %v1968_v58 }
 0x334   :  { %v2168_v16 = vadd.f32 %v2152_v63, %v2118_v9 }
 0x335   :  { %v2167_v53 = vadd.f32 %v2151_v45, %v2113_v28  ;;  %v2515_v55 = vpop.f32.mrb[50].mxu1 }
 0x336   :  { %v2184_v18 = vmax.f32 %v2168_v16, 0.0  ;;  %v2128_v59 = vadd.f32 %v2515_v55, %v1983_v22  ;;  %v2122_v47 = vpop.f32.mrb[51].mxu1 }
 0x337   :  { %v2183_v20 = vmax.f32 %v2167_v53, 0.0  ;;  %v2123_v37 = vadd.f32 %v2122_v47, %v1978_v42 }
 0x338   :  { %2200 = vst.msk [vmem:[#allocation3 + $0x58] sm:$0xff] %vm21_vm0, %v2184_v18  ;;  %v2170_v27 = vadd.f32 %v2154_v30, %v2128_v59 }
 0x339   :  { %2199 = vst.msk [vmem:[#allocation3 + $0x50] sm:$0xff] %vm21_vm0, %v2183_v20  ;;  %v2169_v3 = vadd.f32 %v2153_v40, %v2123_v37  ;;  %v2518_v57 = vpop.f32.mrb[52].mxu1 }
 0x33a   :  { %v2186_v34 = vmax.f32 %v2170_v27, 0.0  ;;  %v2138_v62 = vadd.f32 %v2518_v57, %v1993_v48  ;;  %v2132_v25 = vpop.f32.mrb[53].mxu1 }
 0x33b   :  { %v2185_v15 = vmax.f32 %v2169_v3, 0.0  ;;  %v2133_v5 = vadd.f32 %v2132_v25, %v1988_v1 }
 0x33c   :  { %2202 = vst.msk [vmem:[#allocation3 + $0x68] sm:$0xff] %vm21_vm0, %v2186_v34  ;;  %v2172_v24 = vadd.f32 %v2156_v32, %v2138_v62 }
 0x33d   :  { %2201 = vst.msk [vmem:[#allocation3 + $0x60] sm:$0xff] %vm21_vm0, %v2185_v15  ;;  %v2171_v36 = vadd.f32 %v2155_v4, %v2133_v5 }
 0x33e   :  { %v2188_v0 = vmax.f32 %v2172_v24, 0.0 }
 0x33f   :  { %v2187_v52 = vmax.f32 %v2171_v36, 0.0 }
 0x340   :  { %2204 = vst.msk [vmem:[#allocation3 + $0x78] sm:$0xff] %vm21_vm0, %v2188_v0 }
 0x341   :  { %2203 = vst.msk [vmem:[#allocation3 + $0x70] sm:$0xff] %vm21_vm0, %v2187_v52 }
 0x342   :  { %3102 = shalt.err (!%p3099_p4)
}
 0x343   :  { %s3103_s16 = scalar_lea.hbm %s4335_s5, 2048 }
 0x344   :  { %p3104_p5 = scmp.ne.s32.totalorder %s4335_s5, %s3103_s16  ;;  %p3107_p6 = scmp.lt.u32.totalorder %s3103_s16, %s4335_s5 }
 0x346   :  { %p3109_p7 = pnand %p3107_p6, %p3104_p5 }
 0x348   :  { %3112 = shalt.err (!%p3109_p7)
}
 0x349   :  { %s3120_s21 = smov 128   ;;  %s3121_s22 = smov 8  }
 0x34a   :  { %2216 = dma.vmem_to_hbm [thread:$0]  %s2211_s10, 2048, %s4335_s5, [#allocation4], %s3120_s21, %s3120_s21, %s3121_s22  }
 0x34b   :  { %3113 = dma.done.wait [#allocation4], 2048  }
 0x34c   :  { %3114 = vsyncadd [#allocation4], 4294965248 }
 0x34d   :  { %2220 = vsyncpa [#allocation4], 1 }

</bundles_post_ra>
